<compile_context>
chip_gen: v7x
topology: tpu7x:2x2x1
jax: 0.10.0
libtpu: 0.0.40
codegen_flags: <defaults>
</compile_context>

<pallas_src>
import functools

import jax
import jax.numpy as jnp
from jax import lax
from jax.experimental import pallas as pl
from jax.experimental.pallas import tpu as pltpu


_STRIP = 8            # row-strip height inside a block (sublane multiple)
_MAX_TILE_W = 512     # lanes; an (8, 512) f32 strip array is 4 vregs
_MAX_TILE_H = 256
_PARAMS_PER_POINT = 9  # px, py, qx, qy, c1, c2, -2px, -2py, px^2+py^2+eps


def _mls_kernel(t_ref, prm_ref, ox_ref, oy_ref, *, approx=True):
    """Fused single-pass MLS rigid deformation for one (tile_h, tile_w) tile.

    t_ref   : SMEM f32[2]    -- centering offset (centroid of pi), (tx, ty)
    prm_ref : SMEM f32[N*9]  -- per control point (centroid-centered):
              [px, py, qx, qy, px*qx+py*qy, py*qx-px*qy,
               -2px, -2py, px^2+py^2+1e-9]
    ox/oy   : VMEM f32[tile_h, tile_w] -- map_x / map_y planes (lane-dense)
    """
    i = pl.program_id(0)   # tile index along H (rows -> sublanes)
    j = pl.program_id(1)   # tile index along W (cols -> lanes)
    th, tw = ox_ref.shape
    n_pts = prm_ref.shape[0] // _PARAMS_PER_POINT

    tx = t_ref[0]
    ty = t_ref[1]

    # Hoist all per-point SMEM scalar reads out of the strip loop (cheap sld's
    # done once per block; avoids repeated scalar traffic inside the hot loop).
    pts = []
    for n in range(n_pts):
        base = _PARAMS_PER_POINT * n
        pts.append(tuple(prm_ref[base + k] for k in range(_PARAMS_PER_POINT)))

    row0 = i * th
    col0 = j * tw

    # x (lane) coordinate does not depend on the strip index -> hoist it.
    vx = (col0 + lax.broadcasted_iota(jnp.int32, (_STRIP, tw), 1)
          ).astype(jnp.float32) - tx

    n_strips = th // _STRIP

    def strip_body(s, carry):
        # Strip loop bounds accumulator live ranges to (8, tile_w) arrays so
        # everything stays in vregs (the fully unrolled version spilled to
        # VMEM and became store-slot bound).
        r0 = pl.multiple_of(s * _STRIP, _STRIP)
        vy = (row0 + r0 + lax.broadcasted_iota(jnp.int32, (_STRIP, tw), 0)
              ).astype(jnp.float32) - ty
        r2 = vx * vx + vy * vy

        zeros = jnp.zeros((_STRIP, tw), jnp.float32)
        sw = zeros     # sum w
        swpx = zeros   # sum w * px
        swpy = zeros
        swqx = zeros   # sum w * qx
        swqy = zeros
        s1 = zeros     # sum w * (px*qx + py*qy)
        s2 = zeros     # sum w * (py*qx - px*qy)

        # Single fused pass over the control points (unrolled: N static, small).
        for (px, py, qx, qy, c1, c2, a, b, c) in pts:
            if approx:
                # Expanded |p-v|^2 + eps: no dx/dy temporaries.  The floor
                # guards against cancellation making den <= 0 (e.g. integer
                # control points exactly on a pixel); weights ride the EUP.
                den = (r2 + c) + (a * vx + b * vy)
                den = jnp.maximum(den, 1e-9)
                w = pl.reciprocal(den, approx=True)
            else:
                dx = px - vx
                dy = py - vy
                w = 1.0 / (dx * dx + dy * dy + 1e-9)
            sw = sw + w
            swpx = swpx + w * px
            swpy = swpy + w * py
            swqx = swqx + w * qx
            swqy = swqy + w * qy
            s1 = s1 + w * c1
            s2 = s2 + w * c2

        # Per-pixel epilogue (amortized over N).  1/sw stays an exact divide:
        # it sets the absolute accuracy of the output coordinates.
        inv_sw = 1.0 / sw
        pstar_x = swpx * inv_sw
        pstar_y = swpy * inv_sw
        qstar_x = swqx * inv_sw
        qstar_y = swqy * inv_sw
        vpx = vx - pstar_x
        vpy = vy - pstar_y
        # A = sum w*(phat . qhat), B = sum w*(phat x qhat) in fused one-pass
        # form (no second pass over the control points).
        a_acc = s1 - (swpx * swqx + swpy * swqy) * inv_sw
        b_acc = s2 - (swqx * swpy - swqy * swpx) * inv_sw
        frv_x = a_acc * vpx + b_acc * vpy
        frv_y = a_acc * vpy - b_acc * vpx
        vp_norm = jnp.sqrt(vpx * vpx + vpy * vpy)
        frv2 = frv_x * frv_x + frv_y * frv_y
        if approx:
            scale = vp_norm * lax.rsqrt(frv2 + 1e-20)   # EUP rsqrt, no divide
        else:
            scale = vp_norm / (jnp.sqrt(frv2) + 1e-10)  # matches ref exactly
        ox_ref[pl.ds(r0, _STRIP), :] = scale * frv_x + (qstar_x + tx)
        oy_ref[pl.ds(r0, _STRIP), :] = scale * frv_y + (qstar_y + ty)
        return carry

    lax.fori_loop(0, n_strips, strip_body, 0)


def _round_up(x, m):
    return -(-x // m) * m


def _choose_tiles(h, w, max_tile_h=_MAX_TILE_H, max_tile_w=_MAX_TILE_W):
    """Padding-aware, v7x-balanced tile selection.

    tile_w: multiple of 128 (lane-dense unmasked vst), minimal padded columns,
            capped at 512 so the in-kernel (8, tile_w) strips keep every
            accumulator in vregs.
    tile_h: multiple of 8, chosen to minimize padded rows (the kernel is
            compute-per-pixel bound, padding is pure wasted VALU work), to
            prefer an even total number of 'parallel' grid steps (v7x runs the
            grid on 2 TensorCores) and a small step count (~0.35us per step).
    """
    total = h * w

    wp_min = _round_up(w, 128)
    tw = min(range(128, min(max_tile_w, wp_min) + 1, 128),
             key=lambda t: (_round_up(w, t) - w, -t))
    wp = _round_up(w, tw)
    gw = wp // tw

    hp_min = _round_up(h, _STRIP)
    splittable = (hp_min // _STRIP) >= 2 or gw >= 2

    def cost(th):
        hp = _round_up(h, th)
        steps = (hp // th) * gw
        waste = (hp * wp - total) / total
        if steps == 1:
            imbalance = 0.5 if splittable else 0.0
        elif steps % 2:
            imbalance = 0.5 / steps
        else:
            imbalance = 0.0
        return waste + imbalance + 5e-4 * steps

    th = min(range(_STRIP, min(max_tile_h, hp_min) + 1, _STRIP), key=cost)
    return th, tw, _round_up(h, th), wp


def mls_rigid_deformation_planes(image, pi, qi, *, approx=True,
                                 max_tile_h=_MAX_TILE_H,
                                 max_tile_w=_MAX_TILE_W):
    """Pallas MLS rigid deformation.

    image : (H, W, C) -- only the spatial shape is used (as in the torch code)
    pi, qi: (N, 2)    -- control points, (x, y) order
    Returns (map_x, map_y): two (H, W) float32 planes (lane-dense; preferred
    over the (H, W, 2) drop-in which needs an extra HBM pass to stack).
    approx=False selects the exact fallback (exact weights / sqrt / divide).
    """
    H, W = image.shape[0], image.shape[1]
    pi = jnp.asarray(pi, jnp.float32)
    qi = jnp.asarray(qi, jnp.float32)

    # Center the control points on their centroid: MLS is translation
    # equivariant, and centering keeps the fused / expanded products well
    # conditioned.  The offset is added back inside the kernel.
    t = jnp.mean(pi, axis=0)                                  # (tx, ty)
    pc = pi - t
    qc = qi - t
    c1 = pc[:, 0] * qc[:, 0] + pc[:, 1] * qc[:, 1]
    c2 = pc[:, 1] * qc[:, 0] - pc[:, 0] * qc[:, 1]
    a = -2.0 * pc[:, 0]
    b = -2.0 * pc[:, 1]
    c = pc[:, 0] * pc[:, 0] + pc[:, 1] * pc[:, 1] + 1e-9
    params = jnp.stack([pc[:, 0], pc[:, 1], qc[:, 0], qc[:, 1],
                        c1, c2, a, b, c], axis=1).reshape(-1)  # flat (N*9,)

    th, tw, Hp, Wp = _choose_tiles(H, W, max_tile_h, max_tile_w)
    grid = (Hp // th, Wp // tw)

    out_x, out_y = pl.pallas_call(
        functools.partial(_mls_kernel, approx=approx),
        out_shape=(
            jax.ShapeDtypeStruct((Hp, Wp), jnp.float32),
            jax.ShapeDtypeStruct((Hp, Wp), jnp.float32),
        ),
        grid=grid,
        in_specs=[
            pl.BlockSpec(memory_space=pltpu.MemorySpace.SMEM),  # t: (2,)
            pl.BlockSpec(memory_space=pltpu.MemorySpace.SMEM),  # params: (N*9,)
        ],
        out_specs=(
            pl.BlockSpec((th, tw), lambda i, j: (i, j)),
            pl.BlockSpec((th, tw), lambda i, j: (i, j)),
        ),
        compiler_params=pltpu.CompilerParams(
            dimension_semantics=("parallel", "parallel"),
        ),
    )(t, params)

    if (Hp, Wp) != (H, W):
        out_x = out_x[:H, :W]
        out_y = out_y[:H, :W]
    return out_x, out_y


def mls_rigid_deformation(image, pi, qi, *, approx=True,
                          max_tile_h=_MAX_TILE_H, max_tile_w=_MAX_TILE_W):
    """Drop-in for MlsDeformModule.forward: returns mapxy of shape (H, W, 2).

    The final stack is one extra HBM pass with a lane-sparse last dim; TPU-side
    consumers should prefer mls_rigid_deformation_planes().
    """
    mx, my = mls_rigid_deformation_planes(
        image, pi, qi, approx=approx,
        max_tile_h=max_tile_h, max_tile_w=max_tile_w)
    return jnp.stack([mx, my], axis=-1)


def mls_rigid_deformation_ref(image, pi, qi):
    """Pure-JAX reference mirroring the torch code exactly (for verification)."""
    H, W = image.shape[0], image.shape[1]
    pi = pi.astype(jnp.float32)
    qi = qi.astype(jnp.float32)
    hi = lax.Precision.HIGHEST
    vx = jnp.broadcast_to(jnp.arange(W, dtype=jnp.float32)[:, None], (W, H))
    vy = jnp.broadcast_to(jnp.arange(H, dtype=jnp.float32)[None, :], (W, H))
    v = jnp.stack([vx, vy], axis=-1)                       # (W, H, 2), v[x,y]=(x,y)
    diff = pi[None, None, :, :] - v[:, :, None, :]         # (W, H, N, 2)
    w = 1.0 / (jnp.sum(diff * diff, axis=3) + 1e-9)        # (W, H, N)
    sw = jnp.sum(w, axis=2, keepdims=True)                 # (W, H, 1)
    pstar = jnp.matmul(w, pi, precision=hi) / sw           # (W, H, 2)
    qstar = jnp.matmul(w, qi, precision=hi) / sw
    phat = pi[None, None] - pstar[:, :, None]              # (W, H, N, 2)
    qhat = qi[None, None] - qstar[:, :, None]
    vp = v - pstar                                         # (W, H, 2)
    a = phat[..., 0] * vp[:, :, None, 0] + phat[..., 1] * vp[:, :, None, 1]
    b = phat[..., 0] * vp[:, :, None, 1] - phat[..., 1] * vp[:, :, None, 0]
    frv_x = jnp.sum(w * (qhat[..., 0] * a - qhat[..., 1] * b), axis=2)
    frv_y = jnp.sum(w * (qhat[..., 0] * b + qhat[..., 1] * a), axis=2)
    vp_norm = jnp.sqrt(vp[..., 0] ** 2 + vp[..., 1] ** 2)
    frv_norm = jnp.sqrt(frv_x ** 2 + frv_y ** 2) + 1e-10
    fvx = vp_norm * frv_x / frv_norm + qstar[..., 0]
    fvy = vp_norm * frv_y / frv_norm + qstar[..., 1]
    fv = jnp.stack([fvx, fvy], axis=-1)                    # (W, H, 2)
    return jnp.transpose(fv, (1, 0, 2))                    # (H, W, 2)


if __name__ == "__main__":
    # 512x512 image, 8 control points.  _choose_tiles picks (256, 512) tiles
    # -> grid (2, 1): two lane-dense 'parallel' steps (one per v7x TensorCore).
    H, W, C, N = 512, 512, 3, 8
    key = jax.random.PRNGKey(0)
    k_img, k_pi, k_dq = jax.random.split(key, 3)

    image = jax.random.normal(k_img, (H, W, C), dtype=jnp.float32)
    # control points inside the image, fractional coords
    pi = jax.random.uniform(k_pi, (N, 2), dtype=jnp.float32) \
         * jnp.array([W - 1.0, H - 1.0], jnp.float32)
    qi = pi + 2.0 * jax.random.normal(k_dq, (N, 2), dtype=jnp.float32)

    # Fast path (approx EUP reciprocal / rsqrt), drop-in (H, W, 2) output.
    mapxy = mls_rigid_deformation(image, pi, qi)
    mapxy = jax.block_until_ready(mapxy)
    assert mapxy.shape == (H, W, 2), mapxy.shape

    # Exact fallback path (exact divides / sqrt), planes output.
    mx, my = mls_rigid_deformation_planes(image, pi, qi, approx=False)
    jax.block_until_ready((mx, my))

    ref = mls_rigid_deformation_ref(image, pi, qi)
    err_exact = float(jnp.max(jnp.abs(jnp.stack([mx, my], axis=-1) - ref)))
    err_fast = float(jnp.max(jnp.abs(mapxy - ref)))
    # Exact path only differs from the reference by the fused one-pass algebra
    # (tight check); the fast path additionally uses the approx reciprocal /
    # rsqrt shortcuts (sub-half-pixel agreement).
    assert err_exact < 0.15, err_exact
    assert err_fast < 0.5, err_fast

    print("KERNEL_OK")
</pallas_src>

<mosaic_0001>
module attributes {stable_mosaic.version = 11 : i64} {
  func.func @_mls_kernel(%arg0: i32, %arg1: i32, %arg2: memref<2xf32, #tpu.memory_space<smem>>, %arg3: memref<72xf32, #tpu.memory_space<smem>>, %arg4: memref<256x512xf32, #tpu.memory_space<vmem>>, %arg5: memref<256x512xf32, #tpu.memory_space<vmem>>) attributes {dimension_semantics = [#tpu.dimension_semantics<parallel>, #tpu.dimension_semantics<parallel>], iteration_bounds = array<i64: 2, 1>, scalar_prefetch = 0 : i64, scratch_operands = 0 : i64, tpu.core_type = #tpu.core_type<tc>, window_params = [{transform_indices = @transform_0, window_bounds = array<i64: 2>}, {transform_indices = @transform_1, window_bounds = array<i64: 72>}, {transform_indices = @transform_2, window_bounds = array<i64: 256, 512>}, {transform_indices = @transform_3, window_bounds = array<i64: 256, 512>}]} {
    %c0 = arith.constant 0 : index
    %0 = memref.load %arg2[%c0] : memref<2xf32, #tpu.memory_space<smem>>
    %c1 = arith.constant 1 : index
    %1 = memref.load %arg2[%c1] : memref<2xf32, #tpu.memory_space<smem>>
    %c0_0 = arith.constant 0 : index
    %2 = memref.load %arg3[%c0_0] : memref<72xf32, #tpu.memory_space<smem>>
    %c1_1 = arith.constant 1 : index
    %3 = memref.load %arg3[%c1_1] : memref<72xf32, #tpu.memory_space<smem>>
    %c2 = arith.constant 2 : index
    %4 = memref.load %arg3[%c2] : memref<72xf32, #tpu.memory_space<smem>>
    %c3 = arith.constant 3 : index
    %5 = memref.load %arg3[%c3] : memref<72xf32, #tpu.memory_space<smem>>
    %c4 = arith.constant 4 : index
    %6 = memref.load %arg3[%c4] : memref<72xf32, #tpu.memory_space<smem>>
    %c5 = arith.constant 5 : index
    %7 = memref.load %arg3[%c5] : memref<72xf32, #tpu.memory_space<smem>>
    %c6 = arith.constant 6 : index
    %8 = memref.load %arg3[%c6] : memref<72xf32, #tpu.memory_space<smem>>
    %c7 = arith.constant 7 : index
    %9 = memref.load %arg3[%c7] : memref<72xf32, #tpu.memory_space<smem>>
    %c8 = arith.constant 8 : index
    %10 = memref.load %arg3[%c8] : memref<72xf32, #tpu.memory_space<smem>>
    %c9 = arith.constant 9 : index
    %11 = memref.load %arg3[%c9] : memref<72xf32, #tpu.memory_space<smem>>
    %c10 = arith.constant 10 : index
    %12 = memref.load %arg3[%c10] : memref<72xf32, #tpu.memory_space<smem>>
    %c11 = arith.constant 11 : index
    %13 = memref.load %arg3[%c11] : memref<72xf32, #tpu.memory_space<smem>>
    %c12 = arith.constant 12 : index
    %14 = memref.load %arg3[%c12] : memref<72xf32, #tpu.memory_space<smem>>
    %c13 = arith.constant 13 : index
    %15 = memref.load %arg3[%c13] : memref<72xf32, #tpu.memory_space<smem>>
    %c14 = arith.constant 14 : index
    %16 = memref.load %arg3[%c14] : memref<72xf32, #tpu.memory_space<smem>>
    %c15 = arith.constant 15 : index
    %17 = memref.load %arg3[%c15] : memref<72xf32, #tpu.memory_space<smem>>
    %c16 = arith.constant 16 : index
    %18 = memref.load %arg3[%c16] : memref<72xf32, #tpu.memory_space<smem>>
    %c17 = arith.constant 17 : index
    %19 = memref.load %arg3[%c17] : memref<72xf32, #tpu.memory_space<smem>>
    %c18 = arith.constant 18 : index
    %20 = memref.load %arg3[%c18] : memref<72xf32, #tpu.memory_space<smem>>
    %c19 = arith.constant 19 : index
    %21 = memref.load %arg3[%c19] : memref<72xf32, #tpu.memory_space<smem>>
    %c20 = arith.constant 20 : index
    %22 = memref.load %arg3[%c20] : memref<72xf32, #tpu.memory_space<smem>>
    %c21 = arith.constant 21 : index
    %23 = memref.load %arg3[%c21] : memref<72xf32, #tpu.memory_space<smem>>
    %c22 = arith.constant 22 : index
    %24 = memref.load %arg3[%c22] : memref<72xf32, #tpu.memory_space<smem>>
    %c23 = arith.constant 23 : index
    %25 = memref.load %arg3[%c23] : memref<72xf32, #tpu.memory_space<smem>>
    %c24 = arith.constant 24 : index
    %26 = memref.load %arg3[%c24] : memref<72xf32, #tpu.memory_space<smem>>
    %c25 = arith.constant 25 : index
    %27 = memref.load %arg3[%c25] : memref<72xf32, #tpu.memory_space<smem>>
    %c26 = arith.constant 26 : index
    %28 = memref.load %arg3[%c26] : memref<72xf32, #tpu.memory_space<smem>>
    %c27 = arith.constant 27 : index
    %29 = memref.load %arg3[%c27] : memref<72xf32, #tpu.memory_space<smem>>
    %c28 = arith.constant 28 : index
    %30 = memref.load %arg3[%c28] : memref<72xf32, #tpu.memory_space<smem>>
    %c29 = arith.constant 29 : index
    %31 = memref.load %arg3[%c29] : memref<72xf32, #tpu.memory_space<smem>>
    %c30 = arith.constant 30 : index
    %32 = memref.load %arg3[%c30] : memref<72xf32, #tpu.memory_space<smem>>
    %c31 = arith.constant 31 : index
    %33 = memref.load %arg3[%c31] : memref<72xf32, #tpu.memory_space<smem>>
    %c32 = arith.constant 32 : index
    %34 = memref.load %arg3[%c32] : memref<72xf32, #tpu.memory_space<smem>>
    %c33 = arith.constant 33 : index
    %35 = memref.load %arg3[%c33] : memref<72xf32, #tpu.memory_space<smem>>
    %c34 = arith.constant 34 : index
    %36 = memref.load %arg3[%c34] : memref<72xf32, #tpu.memory_space<smem>>
    %c35 = arith.constant 35 : index
    %37 = memref.load %arg3[%c35] : memref<72xf32, #tpu.memory_space<smem>>
    %c36 = arith.constant 36 : index
    %38 = memref.load %arg3[%c36] : memref<72xf32, #tpu.memory_space<smem>>
    %c37 = arith.constant 37 : index
    %39 = memref.load %arg3[%c37] : memref<72xf32, #tpu.memory_space<smem>>
    %c38 = arith.constant 38 : index
    %40 = memref.load %arg3[%c38] : memref<72xf32, #tpu.memory_space<smem>>
    %c39 = arith.constant 39 : index
    %41 = memref.load %arg3[%c39] : memref<72xf32, #tpu.memory_space<smem>>
    %c40 = arith.constant 40 : index
    %42 = memref.load %arg3[%c40] : memref<72xf32, #tpu.memory_space<smem>>
    %c41 = arith.constant 41 : index
    %43 = memref.load %arg3[%c41] : memref<72xf32, #tpu.memory_space<smem>>
    %c42 = arith.constant 42 : index
    %44 = memref.load %arg3[%c42] : memref<72xf32, #tpu.memory_space<smem>>
    %c43 = arith.constant 43 : index
    %45 = memref.load %arg3[%c43] : memref<72xf32, #tpu.memory_space<smem>>
    %c44 = arith.constant 44 : index
    %46 = memref.load %arg3[%c44] : memref<72xf32, #tpu.memory_space<smem>>
    %c45 = arith.constant 45 : index
    %47 = memref.load %arg3[%c45] : memref<72xf32, #tpu.memory_space<smem>>
    %c46 = arith.constant 46 : index
    %48 = memref.load %arg3[%c46] : memref<72xf32, #tpu.memory_space<smem>>
    %c47 = arith.constant 47 : index
    %49 = memref.load %arg3[%c47] : memref<72xf32, #tpu.memory_space<smem>>
    %c48 = arith.constant 48 : index
    %50 = memref.load %arg3[%c48] : memref<72xf32, #tpu.memory_space<smem>>
    %c49 = arith.constant 49 : index
    %51 = memref.load %arg3[%c49] : memref<72xf32, #tpu.memory_space<smem>>
    %c50 = arith.constant 50 : index
    %52 = memref.load %arg3[%c50] : memref<72xf32, #tpu.memory_space<smem>>
    %c51 = arith.constant 51 : index
    %53 = memref.load %arg3[%c51] : memref<72xf32, #tpu.memory_space<smem>>
    %c52 = arith.constant 52 : index
    %54 = memref.load %arg3[%c52] : memref<72xf32, #tpu.memory_space<smem>>
    %c53 = arith.constant 53 : index
    %55 = memref.load %arg3[%c53] : memref<72xf32, #tpu.memory_space<smem>>
    %c54 = arith.constant 54 : index
    %56 = memref.load %arg3[%c54] : memref<72xf32, #tpu.memory_space<smem>>
    %c55 = arith.constant 55 : index
    %57 = memref.load %arg3[%c55] : memref<72xf32, #tpu.memory_space<smem>>
    %c56 = arith.constant 56 : index
    %58 = memref.load %arg3[%c56] : memref<72xf32, #tpu.memory_space<smem>>
    %c57 = arith.constant 57 : index
    %59 = memref.load %arg3[%c57] : memref<72xf32, #tpu.memory_space<smem>>
    %c58 = arith.constant 58 : index
    %60 = memref.load %arg3[%c58] : memref<72xf32, #tpu.memory_space<smem>>
    %c59 = arith.constant 59 : index
    %61 = memref.load %arg3[%c59] : memref<72xf32, #tpu.memory_space<smem>>
    %c60 = arith.constant 60 : index
    %62 = memref.load %arg3[%c60] : memref<72xf32, #tpu.memory_space<smem>>
    %c61 = arith.constant 61 : index
    %63 = memref.load %arg3[%c61] : memref<72xf32, #tpu.memory_space<smem>>
    %c62 = arith.constant 62 : index
    %64 = memref.load %arg3[%c62] : memref<72xf32, #tpu.memory_space<smem>>
    %c63 = arith.constant 63 : index
    %65 = memref.load %arg3[%c63] : memref<72xf32, #tpu.memory_space<smem>>
    %c64 = arith.constant 64 : index
    %66 = memref.load %arg3[%c64] : memref<72xf32, #tpu.memory_space<smem>>
    %c65 = arith.constant 65 : index
    %67 = memref.load %arg3[%c65] : memref<72xf32, #tpu.memory_space<smem>>
    %c66 = arith.constant 66 : index
    %68 = memref.load %arg3[%c66] : memref<72xf32, #tpu.memory_space<smem>>
    %c67 = arith.constant 67 : index
    %69 = memref.load %arg3[%c67] : memref<72xf32, #tpu.memory_space<smem>>
    %c68 = arith.constant 68 : index
    %70 = memref.load %arg3[%c68] : memref<72xf32, #tpu.memory_space<smem>>
    %c69 = arith.constant 69 : index
    %71 = memref.load %arg3[%c69] : memref<72xf32, #tpu.memory_space<smem>>
    %c70 = arith.constant 70 : index
    %72 = memref.load %arg3[%c70] : memref<72xf32, #tpu.memory_space<smem>>
    %c71 = arith.constant 71 : index
    %73 = memref.load %arg3[%c71] : memref<72xf32, #tpu.memory_space<smem>>
    %c256_i32 = arith.constant 256 : i32
    %74 = arith.muli %arg0, %c256_i32 : i32
    %c512_i32 = arith.constant 512 : i32
    %75 = arith.muli %arg1, %c512_i32 : i32
    %76 = tpu.iota {dimensions = array<i32: 1>} : vector<8x512xi32>
    %77 = vector.broadcast %75 : i32 to vector<8x512xi32>
    %78 = arith.addi %77, %76 : vector<8x512xi32>
    %79 = arith.sitofp %78 : vector<8x512xi32> to vector<8x512xf32>
    %80 = vector.broadcast %0 : f32 to vector<8x512xf32>
    %81 = arith.subf %79, %80 : vector<8x512xf32>
    %c0_i32 = arith.constant 0 : i32
    %c32_i32 = arith.constant 32 : i32
    %82 = arith.addi %c0_i32, %c32_i32 : i32
    %c1_i32 = arith.constant 1 : i32
    scf.for %arg6 = %c0_i32 to %82 step %c1_i32  : i32 {
      %c8_i32 = arith.constant 8 : i32
      %83 = arith.muli %arg6, %c8_i32 : i32
      %84 = tpu.assume_multiple %83, 8 : i32
      %85 = arith.addi %74, %84 : i32
      %86 = tpu.iota {dimensions = array<i32: 0>} : vector<8x512xi32>
      %87 = vector.broadcast %85 : i32 to vector<8x512xi32>
      %88 = arith.addi %87, %86 : vector<8x512xi32>
      %89 = arith.sitofp %88 : vector<8x512xi32> to vector<8x512xf32>
      %90 = vector.broadcast %1 : f32 to vector<8x512xf32>
      %91 = arith.subf %89, %90 : vector<8x512xf32>
      %92 = arith.mulf %81, %81 : vector<8x512xf32>
      %93 = arith.mulf %91, %91 : vector<8x512xf32>
      %94 = arith.addf %92, %93 : vector<8x512xf32>
      %cst = arith.constant 0.000000e+00 : f32
      %95 = vector.broadcast %cst : f32 to vector<8x512xf32>
      %96 = vector.broadcast %10 : f32 to vector<8x512xf32>
      %97 = arith.addf %94, %96 : vector<8x512xf32>
      %98 = vector.broadcast %8 : f32 to vector<8x512xf32>
      %99 = arith.mulf %98, %81 : vector<8x512xf32>
      %100 = vector.broadcast %9 : f32 to vector<8x512xf32>
      %101 = arith.mulf %100, %91 : vector<8x512xf32>
      %102 = arith.addf %99, %101 : vector<8x512xf32>
      %103 = arith.addf %97, %102 : vector<8x512xf32>
      %cst_3 = arith.constant 9.99999971E-10 : f32
      %104 = vector.broadcast %cst_3 : f32 to vector<8x512xf32>
      %105 = arith.maximumf %103, %104 : vector<8x512xf32>
      %106 = tpu.reciprocal %105 {approx = true} : vector<8x512xf32> -> vector<8x512xf32>
      %107 = arith.addf %95, %106 : vector<8x512xf32>
      %108 = vector.broadcast %2 : f32 to vector<8x512xf32>
      %109 = arith.mulf %106, %108 : vector<8x512xf32>
      %110 = arith.addf %95, %109 : vector<8x512xf32>
      %111 = vector.broadcast %3 : f32 to vector<8x512xf32>
      %112 = arith.mulf %106, %111 : vector<8x512xf32>
      %113 = arith.addf %95, %112 : vector<8x512xf32>
      %114 = vector.broadcast %4 : f32 to vector<8x512xf32>
      %115 = arith.mulf %106, %114 : vector<8x512xf32>
      %116 = arith.addf %95, %115 : vector<8x512xf32>
      %117 = vector.broadcast %5 : f32 to vector<8x512xf32>
      %118 = arith.mulf %106, %117 : vector<8x512xf32>
      %119 = arith.addf %95, %118 : vector<8x512xf32>
      %120 = vector.broadcast %6 : f32 to vector<8x512xf32>
      %121 = arith.mulf %106, %120 : vector<8x512xf32>
      %122 = arith.addf %95, %121 : vector<8x512xf32>
      %123 = vector.broadcast %7 : f32 to vector<8x512xf32>
      %124 = arith.mulf %106, %123 : vector<8x512xf32>
      %125 = arith.addf %95, %124 : vector<8x512xf32>
      %126 = vector.broadcast %19 : f32 to vector<8x512xf32>
      %127 = arith.addf %94, %126 : vector<8x512xf32>
      %128 = vector.broadcast %17 : f32 to vector<8x512xf32>
      %129 = arith.mulf %128, %81 : vector<8x512xf32>
      %130 = vector.broadcast %18 : f32 to vector<8x512xf32>
      %131 = arith.mulf %130, %91 : vector<8x512xf32>
      %132 = arith.addf %129, %131 : vector<8x512xf32>
      %133 = arith.addf %127, %132 : vector<8x512xf32>
      %cst_4 = arith.constant 9.99999971E-10 : f32
      %134 = vector.broadcast %cst_4 : f32 to vector<8x512xf32>
      %135 = arith.maximumf %133, %134 : vector<8x512xf32>
      %136 = tpu.reciprocal %135 {approx = true} : vector<8x512xf32> -> vector<8x512xf32>
      %137 = arith.addf %107, %136 : vector<8x512xf32>
      %138 = vector.broadcast %11 : f32 to vector<8x512xf32>
      %139 = arith.mulf %136, %138 : vector<8x512xf32>
      %140 = arith.addf %110, %139 : vector<8x512xf32>
      %141 = vector.broadcast %12 : f32 to vector<8x512xf32>
      %142 = arith.mulf %136, %141 : vector<8x512xf32>
      %143 = arith.addf %113, %142 : vector<8x512xf32>
      %144 = vector.broadcast %13 : f32 to vector<8x512xf32>
      %145 = arith.mulf %136, %144 : vector<8x512xf32>
      %146 = arith.addf %116, %145 : vector<8x512xf32>
      %147 = vector.broadcast %14 : f32 to vector<8x512xf32>
      %148 = arith.mulf %136, %147 : vector<8x512xf32>
      %149 = arith.addf %119, %148 : vector<8x512xf32>
      %150 = vector.broadcast %15 : f32 to vector<8x512xf32>
      %151 = arith.mulf %136, %150 : vector<8x512xf32>
      %152 = arith.addf %122, %151 : vector<8x512xf32>
      %153 = vector.broadcast %16 : f32 to vector<8x512xf32>
      %154 = arith.mulf %136, %153 : vector<8x512xf32>
      %155 = arith.addf %125, %154 : vector<8x512xf32>
      %156 = vector.broadcast %28 : f32 to vector<8x512xf32>
      %157 = arith.addf %94, %156 : vector<8x512xf32>
      %158 = vector.broadcast %26 : f32 to vector<8x512xf32>
      %159 = arith.mulf %158, %81 : vector<8x512xf32>
      %160 = vector.broadcast %27 : f32 to vector<8x512xf32>
      %161 = arith.mulf %160, %91 : vector<8x512xf32>
      %162 = arith.addf %159, %161 : vector<8x512xf32>
      %163 = arith.addf %157, %162 : vector<8x512xf32>
      %cst_5 = arith.constant 9.99999971E-10 : f32
      %164 = vector.broadcast %cst_5 : f32 to vector<8x512xf32>
      %165 = arith.maximumf %163, %164 : vector<8x512xf32>
      %166 = tpu.reciprocal %165 {approx = true} : vector<8x512xf32> -> vector<8x512xf32>
      %167 = arith.addf %137, %166 : vector<8x512xf32>
      %168 = vector.broadcast %20 : f32 to vector<8x512xf32>
      %169 = arith.mulf %166, %168 : vector<8x512xf32>
      %170 = arith.addf %140, %169 : vector<8x512xf32>
      %171 = vector.broadcast %21 : f32 to vector<8x512xf32>
      %172 = arith.mulf %166, %171 : vector<8x512xf32>
      %173 = arith.addf %143, %172 : vector<8x512xf32>
      %174 = vector.broadcast %22 : f32 to vector<8x512xf32>
      %175 = arith.mulf %166, %174 : vector<8x512xf32>
      %176 = arith.addf %146, %175 : vector<8x512xf32>
      %177 = vector.broadcast %23 : f32 to vector<8x512xf32>
      %178 = arith.mulf %166, %177 : vector<8x512xf32>
      %179 = arith.addf %149, %178 : vector<8x512xf32>
      %180 = vector.broadcast %24 : f32 to vector<8x512xf32>
      %181 = arith.mulf %166, %180 : vector<8x512xf32>
      %182 = arith.addf %152, %181 : vector<8x512xf32>
      %183 = vector.broadcast %25 : f32 to vector<8x512xf32>
      %184 = arith.mulf %166, %183 : vector<8x512xf32>
      %185 = arith.addf %155, %184 : vector<8x512xf32>
      %186 = vector.broadcast %37 : f32 to vector<8x512xf32>
      %187 = arith.addf %94, %186 : vector<8x512xf32>
      %188 = vector.broadcast %35 : f32 to vector<8x512xf32>
      %189 = arith.mulf %188, %81 : vector<8x512xf32>
      %190 = vector.broadcast %36 : f32 to vector<8x512xf32>
      %191 = arith.mulf %190, %91 : vector<8x512xf32>
      %192 = arith.addf %189, %191 : vector<8x512xf32>
      %193 = arith.addf %187, %192 : vector<8x512xf32>
      %cst_6 = arith.constant 9.99999971E-10 : f32
      %194 = vector.broadcast %cst_6 : f32 to vector<8x512xf32>
      %195 = arith.maximumf %193, %194 : vector<8x512xf32>
      %196 = tpu.reciprocal %195 {approx = true} : vector<8x512xf32> -> vector<8x512xf32>
      %197 = arith.addf %167, %196 : vector<8x512xf32>
      %198 = vector.broadcast %29 : f32 to vector<8x512xf32>
      %199 = arith.mulf %196, %198 : vector<8x512xf32>
      %200 = arith.addf %170, %199 : vector<8x512xf32>
      %201 = vector.broadcast %30 : f32 to vector<8x512xf32>
      %202 = arith.mulf %196, %201 : vector<8x512xf32>
      %203 = arith.addf %173, %202 : vector<8x512xf32>
      %204 = vector.broadcast %31 : f32 to vector<8x512xf32>
      %205 = arith.mulf %196, %204 : vector<8x512xf32>
      %206 = arith.addf %176, %205 : vector<8x512xf32>
      %207 = vector.broadcast %32 : f32 to vector<8x512xf32>
      %208 = arith.mulf %196, %207 : vector<8x512xf32>
      %209 = arith.addf %179, %208 : vector<8x512xf32>
      %210 = vector.broadcast %33 : f32 to vector<8x512xf32>
      %211 = arith.mulf %196, %210 : vector<8x512xf32>
      %212 = arith.addf %182, %211 : vector<8x512xf32>
      %213 = vector.broadcast %34 : f32 to vector<8x512xf32>
      %214 = arith.mulf %196, %213 : vector<8x512xf32>
      %215 = arith.addf %185, %214 : vector<8x512xf32>
      %216 = vector.broadcast %46 : f32 to vector<8x512xf32>
      %217 = arith.addf %94, %216 : vector<8x512xf32>
      %218 = vector.broadcast %44 : f32 to vector<8x512xf32>
      %219 = arith.mulf %218, %81 : vector<8x512xf32>
      %220 = vector.broadcast %45 : f32 to vector<8x512xf32>
      %221 = arith.mulf %220, %91 : vector<8x512xf32>
      %222 = arith.addf %219, %221 : vector<8x512xf32>
      %223 = arith.addf %217, %222 : vector<8x512xf32>
      %cst_7 = arith.constant 9.99999971E-10 : f32
      %224 = vector.broadcast %cst_7 : f32 to vector<8x512xf32>
      %225 = arith.maximumf %223, %224 : vector<8x512xf32>
      %226 = tpu.reciprocal %225 {approx = true} : vector<8x512xf32> -> vector<8x512xf32>
      %227 = arith.addf %197, %226 : vector<8x512xf32>
      %228 = vector.broadcast %38 : f32 to vector<8x512xf32>
      %229 = arith.mulf %226, %228 : vector<8x512xf32>
      %230 = arith.addf %200, %229 : vector<8x512xf32>
      %231 = vector.broadcast %39 : f32 to vector<8x512xf32>
      %232 = arith.mulf %226, %231 : vector<8x512xf32>
      %233 = arith.addf %203, %232 : vector<8x512xf32>
      %234 = vector.broadcast %40 : f32 to vector<8x512xf32>
      %235 = arith.mulf %226, %234 : vector<8x512xf32>
      %236 = arith.addf %206, %235 : vector<8x512xf32>
      %237 = vector.broadcast %41 : f32 to vector<8x512xf32>
      %238 = arith.mulf %226, %237 : vector<8x512xf32>
      %239 = arith.addf %209, %238 : vector<8x512xf32>
      %240 = vector.broadcast %42 : f32 to vector<8x512xf32>
      %241 = arith.mulf %226, %240 : vector<8x512xf32>
      %242 = arith.addf %212, %241 : vector<8x512xf32>
      %243 = vector.broadcast %43 : f32 to vector<8x512xf32>
      %244 = arith.mulf %226, %243 : vector<8x512xf32>
      %245 = arith.addf %215, %244 : vector<8x512xf32>
      %246 = vector.broadcast %55 : f32 to vector<8x512xf32>
      %247 = arith.addf %94, %246 : vector<8x512xf32>
      %248 = vector.broadcast %53 : f32 to vector<8x512xf32>
      %249 = arith.mulf %248, %81 : vector<8x512xf32>
      %250 = vector.broadcast %54 : f32 to vector<8x512xf32>
      %251 = arith.mulf %250, %91 : vector<8x512xf32>
      %252 = arith.addf %249, %251 : vector<8x512xf32>
      %253 = arith.addf %247, %252 : vector<8x512xf32>
      %cst_8 = arith.constant 9.99999971E-10 : f32
      %254 = vector.broadcast %cst_8 : f32 to vector<8x512xf32>
      %255 = arith.maximumf %253, %254 : vector<8x512xf32>
      %256 = tpu.reciprocal %255 {approx = true} : vector<8x512xf32> -> vector<8x512xf32>
      %257 = arith.addf %227, %256 : vector<8x512xf32>
      %258 = vector.broadcast %47 : f32 to vector<8x512xf32>
      %259 = arith.mulf %256, %258 : vector<8x512xf32>
      %260 = arith.addf %230, %259 : vector<8x512xf32>
      %261 = vector.broadcast %48 : f32 to vector<8x512xf32>
      %262 = arith.mulf %256, %261 : vector<8x512xf32>
      %263 = arith.addf %233, %262 : vector<8x512xf32>
      %264 = vector.broadcast %49 : f32 to vector<8x512xf32>
      %265 = arith.mulf %256, %264 : vector<8x512xf32>
      %266 = arith.addf %236, %265 : vector<8x512xf32>
      %267 = vector.broadcast %50 : f32 to vector<8x512xf32>
      %268 = arith.mulf %256, %267 : vector<8x512xf32>
      %269 = arith.addf %239, %268 : vector<8x512xf32>
      %270 = vector.broadcast %51 : f32 to vector<8x512xf32>
      %271 = arith.mulf %256, %270 : vector<8x512xf32>
      %272 = arith.addf %242, %271 : vector<8x512xf32>
      %273 = vector.broadcast %52 : f32 to vector<8x512xf32>
      %274 = arith.mulf %256, %273 : vector<8x512xf32>
      %275 = arith.addf %245, %274 : vector<8x512xf32>
      %276 = vector.broadcast %64 : f32 to vector<8x512xf32>
      %277 = arith.addf %94, %276 : vector<8x512xf32>
      %278 = vector.broadcast %62 : f32 to vector<8x512xf32>
      %279 = arith.mulf %278, %81 : vector<8x512xf32>
      %280 = vector.broadcast %63 : f32 to vector<8x512xf32>
      %281 = arith.mulf %280, %91 : vector<8x512xf32>
      %282 = arith.addf %279, %281 : vector<8x512xf32>
      %283 = arith.addf %277, %282 : vector<8x512xf32>
      %cst_9 = arith.constant 9.99999971E-10 : f32
      %284 = vector.broadcast %cst_9 : f32 to vector<8x512xf32>
      %285 = arith.maximumf %283, %284 : vector<8x512xf32>
      %286 = tpu.reciprocal %285 {approx = true} : vector<8x512xf32> -> vector<8x512xf32>
      %287 = arith.addf %257, %286 : vector<8x512xf32>
      %288 = vector.broadcast %56 : f32 to vector<8x512xf32>
      %289 = arith.mulf %286, %288 : vector<8x512xf32>
      %290 = arith.addf %260, %289 : vector<8x512xf32>
      %291 = vector.broadcast %57 : f32 to vector<8x512xf32>
      %292 = arith.mulf %286, %291 : vector<8x512xf32>
      %293 = arith.addf %263, %292 : vector<8x512xf32>
      %294 = vector.broadcast %58 : f32 to vector<8x512xf32>
      %295 = arith.mulf %286, %294 : vector<8x512xf32>
      %296 = arith.addf %266, %295 : vector<8x512xf32>
      %297 = vector.broadcast %59 : f32 to vector<8x512xf32>
      %298 = arith.mulf %286, %297 : vector<8x512xf32>
      %299 = arith.addf %269, %298 : vector<8x512xf32>
      %300 = vector.broadcast %60 : f32 to vector<8x512xf32>
      %301 = arith.mulf %286, %300 : vector<8x512xf32>
      %302 = arith.addf %272, %301 : vector<8x512xf32>
      %303 = vector.broadcast %61 : f32 to vector<8x512xf32>
      %304 = arith.mulf %286, %303 : vector<8x512xf32>
      %305 = arith.addf %275, %304 : vector<8x512xf32>
      %306 = vector.broadcast %73 : f32 to vector<8x512xf32>
      %307 = arith.addf %94, %306 : vector<8x512xf32>
      %308 = vector.broadcast %71 : f32 to vector<8x512xf32>
      %309 = arith.mulf %308, %81 : vector<8x512xf32>
      %310 = vector.broadcast %72 : f32 to vector<8x512xf32>
      %311 = arith.mulf %310, %91 : vector<8x512xf32>
      %312 = arith.addf %309, %311 : vector<8x512xf32>
      %313 = arith.addf %307, %312 : vector<8x512xf32>
      %cst_10 = arith.constant 9.99999971E-10 : f32
      %314 = vector.broadcast %cst_10 : f32 to vector<8x512xf32>
      %315 = arith.maximumf %313, %314 : vector<8x512xf32>
      %316 = tpu.reciprocal %315 {approx = true} : vector<8x512xf32> -> vector<8x512xf32>
      %317 = arith.addf %287, %316 : vector<8x512xf32>
      %318 = vector.broadcast %65 : f32 to vector<8x512xf32>
      %319 = arith.mulf %316, %318 : vector<8x512xf32>
      %320 = arith.addf %290, %319 : vector<8x512xf32>
      %321 = vector.broadcast %66 : f32 to vector<8x512xf32>
      %322 = arith.mulf %316, %321 : vector<8x512xf32>
      %323 = arith.addf %293, %322 : vector<8x512xf32>
      %324 = vector.broadcast %67 : f32 to vector<8x512xf32>
      %325 = arith.mulf %316, %324 : vector<8x512xf32>
      %326 = arith.addf %296, %325 : vector<8x512xf32>
      %327 = vector.broadcast %68 : f32 to vector<8x512xf32>
      %328 = arith.mulf %316, %327 : vector<8x512xf32>
      %329 = arith.addf %299, %328 : vector<8x512xf32>
      %330 = vector.broadcast %69 : f32 to vector<8x512xf32>
      %331 = arith.mulf %316, %330 : vector<8x512xf32>
      %332 = arith.addf %302, %331 : vector<8x512xf32>
      %333 = vector.broadcast %70 : f32 to vector<8x512xf32>
      %334 = arith.mulf %316, %333 : vector<8x512xf32>
      %335 = arith.addf %305, %334 : vector<8x512xf32>
      %cst_11 = arith.constant 1.000000e+00 : f32
      %336 = vector.broadcast %cst_11 : f32 to vector<8x512xf32>
      %337 = arith.divf %336, %317 : vector<8x512xf32>
      %338 = arith.mulf %320, %337 : vector<8x512xf32>
      %339 = arith.mulf %323, %337 : vector<8x512xf32>
      %340 = arith.mulf %326, %337 : vector<8x512xf32>
      %341 = arith.mulf %329, %337 : vector<8x512xf32>
      %342 = arith.subf %81, %338 : vector<8x512xf32>
      %343 = arith.subf %91, %339 : vector<8x512xf32>
      %344 = arith.mulf %320, %326 : vector<8x512xf32>
      %345 = arith.mulf %323, %329 : vector<8x512xf32>
      %346 = arith.addf %344, %345 : vector<8x512xf32>
      %347 = arith.mulf %346, %337 : vector<8x512xf32>
      %348 = arith.subf %332, %347 : vector<8x512xf32>
      %349 = arith.mulf %326, %323 : vector<8x512xf32>
      %350 = arith.mulf %329, %320 : vector<8x512xf32>
      %351 = arith.subf %349, %350 : vector<8x512xf32>
      %352 = arith.mulf %351, %337 : vector<8x512xf32>
      %353 = arith.subf %335, %352 : vector<8x512xf32>
      %354 = arith.mulf %348, %342 : vector<8x512xf32>
      %355 = arith.mulf %353, %343 : vector<8x512xf32>
      %356 = arith.addf %354, %355 : vector<8x512xf32>
      %357 = arith.mulf %348, %343 : vector<8x512xf32>
      %358 = arith.mulf %353, %342 : vector<8x512xf32>
      %359 = arith.subf %357, %358 : vector<8x512xf32>
      %360 = arith.mulf %342, %342 : vector<8x512xf32>
      %361 = arith.mulf %343, %343 : vector<8x512xf32>
      %362 = arith.addf %360, %361 : vector<8x512xf32>
      %363 = math.sqrt %362 : vector<8x512xf32>
      %364 = arith.mulf %356, %356 : vector<8x512xf32>
      %365 = arith.mulf %359, %359 : vector<8x512xf32>
      %366 = arith.addf %364, %365 : vector<8x512xf32>
      %cst_12 = arith.constant 9.99999968E-21 : f32
      %367 = vector.broadcast %cst_12 : f32 to vector<8x512xf32>
      %368 = arith.addf %366, %367 : vector<8x512xf32>
      %369 = math.rsqrt %368 : vector<8x512xf32>
      %370 = arith.mulf %363, %369 : vector<8x512xf32>
      %371 = arith.mulf %370, %356 : vector<8x512xf32>
      %372 = vector.broadcast %0 : f32 to vector<8x512xf32>
      %373 = arith.addf %340, %372 : vector<8x512xf32>
      %374 = arith.addf %371, %373 : vector<8x512xf32>
      %375 = arith.index_cast %84 : i32 to index
      %c0_13 = arith.constant 0 : index
      %376 = vector.load %arg4[%375, %c0_13] : memref<256x512xf32, #tpu.memory_space<vmem>>, vector<8x512xf32>
      tpu.vector_store %arg4[%375, %c0_13], %374 {strides = array<i32>} : memref<256x512xf32, #tpu.memory_space<vmem>>, vector<8x512xf32>,
      %377 = arith.mulf %370, %359 : vector<8x512xf32>
      %378 = vector.broadcast %1 : f32 to vector<8x512xf32>
      %379 = arith.addf %341, %378 : vector<8x512xf32>
      %380 = arith.addf %377, %379 : vector<8x512xf32>
      %381 = arith.index_cast %84 : i32 to index
      %c0_14 = arith.constant 0 : index
      %382 = vector.load %arg5[%381, %c0_14] : memref<256x512xf32, #tpu.memory_space<vmem>>, vector<8x512xf32>
      tpu.vector_store %arg5[%381, %c0_14], %380 {strides = array<i32>} : memref<256x512xf32, #tpu.memory_space<vmem>>, vector<8x512xf32>,
    }
    %c32_i32_2 = arith.constant 32 : i32
    return
  }
  func.func @transform_0(%arg0: i32, %arg1: i32) -> i32 {
    %c0_i32 = arith.constant 0 : i32
    %c0_i32_0 = arith.constant 0 : i32
    return %c0_i32 : i32
  }
  func.func @transform_1(%arg0: i32, %arg1: i32) -> i32 {
    %c0_i32 = arith.constant 0 : i32
    %c0_i32_0 = arith.constant 0 : i32
    return %c0_i32 : i32
  }
  func.func @transform_2(%arg0: i32, %arg1: i32) -> (i32, i32) {
    %c0_i32 = arith.constant 0 : i32
    return %arg0, %arg1 : i32, i32
  }
  func.func @transform_3(%arg0: i32, %arg1: i32) -> (i32, i32) {
    %c0_i32 = arith.constant 0 : i32
    return %arg0, %arg1 : i32, i32
  }
}

</mosaic_0001>

<bundles_post_ra>
// kernel: tpu_custom_call.1
= control target key start
LH: loop header
LB: loop body
LE: loop exit
PB: predicated region body
PF: predicated region fallthrough
CT: control target
= control target key end

     0   :  { %s3363_s0 = inlined_call_operand.hbm [shape: f32[2], index: 0, kind: input, shape index: {}]   ;;  %s3364_s1 = inlined_call_operand.vmem [shape: f32[72], index: 1, kind: input, shape index: {}]   ;;  %s3365_s2 = inlined_call_operand.hbm [shape: f32[512,512], index: 2, kind: output, shape index: {0}]   ;;  %s3366_s3 = inlined_call_operand.hbm [shape: f32[512,512], index: 3, kind: output, shape index: {1}]  }
   0x1   :  { %3428 = sst [smem:[#allocation108_spill]] %s3363_s0 }
   0x2   :  { %3429 = sst [smem:[#allocation109_spill]] %s3364_s1 }
   0x3   :  { %3430 = sst [smem:[#allocation110_spill]] %s3365_s2 }
   0x4   :  { %3431 = sst [smem:[#allocation111_spill]] %s3366_s3 }
   0x5   :  { %9 = vsyncpa [#allocation4], 0 }
   0x6   :  { %10 = vsyncpa [#allocation5], 0 }
   0x7   :  { %11 = vsyncpa [#allocation3], 0 }
   0x8   :  { %13 = vsyncpa [#allocation3 + $0x1], 0 }
   0x9   :  { %14 = vsyncpa [#allocation9], 0 }
   0xa   :  { %16 = vsyncpa [#allocation9 + $0x1], 0  ;;  %s1845_s12 = smov 0   ;;  %s1847_s13 = smov 0  }
   0xb   :  { %s1849_s14 = smov 0   ;;  %s1851_s15 = smov 0  }
   0xc   :  { %s1853_s16 = smov 0   ;;  %s1855_s17 = smov 0  }
   0xd LB: > { %3432 = sst [smem:[#allocation14_spill]] %s1793_s12  ;;  %s1381_s18 = sadd.s32 4294967295, %s1813_s17   ;;  %s1813_s17 = sphi %s1855_s17, %s22_s17   ;;  %s1809_s16 = sphi %s1853_s16, %s3704_s16   ;;  %s1805_s15 = sphi %s1851_s15, %s3703_s15   ;;  %s1801_s14 = sphi %s1849_s14, %s3702_s14   ;;  %s1797_s13 = sphi %s1847_s13, %s3701_s13   ;;  %s1793_s12 = sphi %s1845_s12, %s3700_s12  }
   0xe   : > { %3433 = sst [smem:[#allocation15_spill]] %s1797_s13  ;;  %s1382_s19 = sadd.s32 4294967294, %s1813_s17  }
   0xf   : > { %3434 = sst [smem:[#allocation16_spill]] %s1801_s14  ;;  %s34_s20 = sadd.s32 1, %s1809_s16 }
  0x10   : > { %3435 = sst [smem:[#allocation17_spill]] %s1809_s16  ;;  %s85_s21 = sadd.s32 1, %s1801_s14 }
  0x11   : > { %3436 = sst [smem:[#allocation18_spill]] %s1813_s17  ;;  %p36_p0 = scmp.ge.s32.totalorder %s34_s20, 2 }
  0x12   : > { %p95_p1 = scmp.ne.s32.totalorder %s1801_s14, %s1797_s13  ;;  %p96_p2 = scmp.eq.s32.totalorder %s1381_s18, 1 }
  0x13   : > { %p101_p3 = scmp.ne.s32.totalorder %s1797_s13, %s1793_s12  ;;  %s3706_s20 = smov (%p36_p0, %s34_s20), 0 }
  0x14   : > { %3437 = sst [smem:[#allocation19_spill]] %s3706_s20  ;;  %p1885_p4 = por %p96_p2, %p95_p1 }
  0x15   : > { %p102_p5 = scmp.eq.s32.totalorder %s1382_s19, 1  ;;  %s80_s23 = ssub.s32 %s1809_s16, %s3706_s20 }
  0x16   : > { %s3438_s22 = scalar_select %p1885_p4, 1, 0 }
  0x17   : > { %p1383_p6 = scmp.ge.s32.totalorder %s1813_s17, 1  ;;  %p83_p7 = scmp.eq.s32.totalorder %s80_s23, 0 }
  0x18   : > { %3439 = sst [smem:[#allocation20_spill]] %s3438_s22  ;;  %p1892_p8 = por %p102_p5, %p101_p3 }
  0x19   : > { %p137_p9 = scmp.lt.s32.totalorder %s1813_s17, 3  ;;  %p1904_p11 = scmp.eq.s32.totalorder %s1381_s18, 0 }
  0x1a   : > { %s3440_s24 = scalar_select %p1892_p8, 1, 0 }
  0x1b   : > { %s1898_s25 = scalar_select %p83_p7, %s1801_s14, %s85_s21  }
  0x1c   : > { %3441 = sst [smem:[#allocation21_spill]] %s3440_s24  ;;  %p1900_p10 = pnand %p1383_p6, %p137_p9 }
  0x1d   : > { %3442 = sst [smem:[#allocation22_spill]] %s1898_s25  ;;  %s3445_s1 = sld [smem:[#allocation109_spill]] }
  0x1e   : > { %p1496_p12 = pneg %p1900_p10  ;;  %s3447_s0 = sld [smem:[#allocation108_spill]] }
  0x20   : > { %p1915_p13 = pnand %p1904_p11, %p1496_p12 }
  0x22   : > { %p1665_p1 = pneg %p1915_p13 }
  0x23   : > { %s159_s30 = sshll.u32 %s3445_s1, 4  ;;  %s160_s30 = int_to_ptr.vmem [resolvable:$true] %s159_s30 }
  0x24   : > { %s1663_s7 = scalar_lea.hbm %s3447_s0, 16 }
  0x25   : > { %p1664_p0 = scmp.ne.s32.totalorder %s3447_s0, %s1663_s7  ;;  %p1670_p5 = scmp.lt.u32.totalorder %s1663_s7, %s3447_s0 }
  0x27   : > { %p1666_p2 = pnand %p1665_p1, %p1664_p0 }
  0x29   : > { %p1667_p3 = pneg %p1666_p2 }
  0x2b   : > { %p1672_p6 = pnand %p1670_p5, %p1667_p3 }
  0x2d   : > { %1675 = shalt.err (!%p1672_p6)
}
  0x2e   : > { %s1819_s18 = smov [#allocation2]   ;;  %s1676_s23 = scalar_lea.vmem %s160_s30, 16 }
  0x2f   : > { %1499 = dma.hbm_to_smem (!%p1915_p13), %s3447_s0, 16, %s1819_s18, [#allocation4]  }
  0x30   : > { %p1677_p7 = scmp.ne.s32.totalorder %s160_s30, %s1676_s23  ;;  %p1684_p8 = scmp.lt.s32.totalorder %s160_s30, %s160_s30 }
  0x31   : > { %p1685_p0 = scmp.lt.s32.totalorder %s1676_s23, %s1676_s23 }
  0x32   : > { %p1679_p9 = pnand %p1677_p7, %p1665_p1 }
  0x33   : > { %p1686_p2 = por %p1685_p0, %p1684_p8 }
  0x34   : > { %p1680_p12 = pneg %p1679_p9 }
  0x36   : > { %p1687_p4 = pnand %p1686_p2, %p1680_p12 }
  0x38   : > { %1690 = shalt.err (!%p1687_p4)
}
  0x39   : > { %s1820_s28 = smov [#allocation6]   ;;  %172 = sbr.rel (%p1900_p10) target bundleno = 402 (0x192), region = 28 }
  0x3a   : > { %1502 = dma.vmem_to_smem (!%p1915_p13), %s160_s30, 16, %s1820_s28, [#allocation5]  }
  0x40   : > { %1776 = dma.done.wait (%p1904_p11), [#allocation4], 16  }
  0x41   : > { %1778 = vsyncadd (%p1904_p11), [#allocation4], 4294967280 }
  0x42   : > { %1780 = dma.done.wait (%p1904_p11), [#allocation5], 16  }
  0x43   : > { %1782 = vsyncadd (%p1904_p11), [#allocation5], 4294967280 }
  0x44   : > { %182 = sfence }
  0x45   : > { %s1948_s29 = sand.u32 1, %s1797_s13   ;;  %s205_s30 = sld [smem:[#allocation2]]  ;;  %v3382_v0 = vlaneseq }
  0x46   : > { %s1951_s4 = sld [smem:[#allocation2 + $0x1]]  ;;  %s1954_s5 = sld [smem:[#allocation6]] }
  0x47   : > { %v282_v1 = vand.u32 127, %v3382_v0  ;;  %s1956_s6 = sld [smem:[#allocation6 + $0x1]]  ;;  %s1958_s7 = sld [smem:[#allocation6 + $0x2]] }
  0x48   : > { %s1960_s27 = sld [smem:[#allocation6 + $0x3]]  ;;  %s1962_s8 = sld [smem:[#allocation6 + $0x4]] }
  0x49   : > { %v283_v2 = vadd.s32 128, %v282_v1  ;;  %v284_v3 = vadd.s32 256, %v282_v1  ;;  %v291_v4 = vcvt.s32.f32 %v282_v1  ;;  %s1964_s9 = sld [smem:[#allocation6 + $0x5]]  ;;  %v285_v5 = vadd.s32 384, %v282_v1  ;;  %s1966_s10 = sld [smem:[#allocation6 + $0x6]] }
  0x4a   : > { %s1968_s11 = sld [smem:[#allocation6 + $0x7]]  ;;  %s1972_s18 = sld [smem:[#allocation6 + $0x8]] }
  0x4b   : > { %v292_v6 = vcvt.s32.f32 %v283_v2  ;;  %v293_v7 = vcvt.s32.f32 %v284_v3  ;;  %v1970_v8 = vstv %s205_s30  ;;  %s1974_s19 = sld [smem:[#allocation6 + $0x9]]  ;;  %v294_v9 = vcvt.s32.f32 %v285_v5  ;;  %s1979_s21 = sld [smem:[#allocation6 + $0xa]] }
  0x4c   : > { %3448 = sst [smem:[#allocation23_spill]] %s1951_s4  ;;  %3454 = vst [vmem:[#allocation29_spill] sm:$0xff] %v1970_v8  ;;  %v1977_v10 = vsub.f32 %v291_v4, %v1970_v8  ;;  %s1981_s23 = sld [smem:[#allocation6 + $0xb]] }
  0x4d   : > { %3449 = sst [smem:[#allocation24_spill]] %s1954_s5  ;;  %v1984_v11 = vsub.f32 %v292_v6, %v1970_v8  ;;  %v1987_v12 = vsub.f32 %v293_v7, %v1970_v8  ;;  %s1989_s28 = sld [smem:[#allocation6 + $0xc]]  ;;  %v1994_v13 = vsub.f32 %v294_v9, %v1970_v8 }
  0x4e   : > { %3450 = sst [smem:[#allocation25_spill]] %s1956_s6  ;;  %3455 = vst [vmem:[#allocation30_spill] sm:$0xff] %v1977_v10  ;;  %s1991_s30 = sld [smem:[#allocation6 + $0xd]] }
  0x4f   : > { %3451 = sst [smem:[#allocation26_spill]] %s1958_s7  ;;  %3458 = vst [vmem:[#allocation33_spill] sm:$0xff] %v1984_v11  ;;  %3459 = vst [vmem:[#allocation34_spill] sm:$0xff] %v1987_v12  ;;  %s1996_s26 = sld [smem:[#allocation6 + $0xe]] }
  0x50   : > { %3452 = sst [smem:[#allocation27_spill]] %s1962_s8  ;;  %3462 = vst [vmem:[#allocation37_spill] sm:$0xff] %v1994_v13  ;;  %s1998_s0 = sld [smem:[#allocation6 + $0xf]] }
  0x51   : > { %3453 = sst [smem:[#allocation28_spill]] %s1964_s9  ;;  %s2000_s1 = sld [smem:[#allocation6 + $0x10]] }
  0x52   : > { %3456 = sst [smem:[#allocation31_spill]] %s1979_s21  ;;  %s2002_s20 = sld [smem:[#allocation6 + $0x11]] }
  0x53   : > { %3457 = sst [smem:[#allocation32_spill]] %s1981_s23  ;;  %s2004_s16 = sld [smem:[#allocation6 + $0x12]] }
  0x54   : > { %3460 = sst [smem:[#allocation35_spill]] %s1989_s28  ;;  %s2006_s25 = sld [smem:[#allocation6 + $0x13]] }
  0x55   : > { %3461 = sst [smem:[#allocation36_spill]] %s1991_s30  ;;  %s2008_s14 = sld [smem:[#allocation6 + $0x14]] }
  0x56   : > { %3463 = sst [smem:[#allocation38_spill]] %s1996_s26  ;;  %s2010_s13 = sld [smem:[#allocation6 + $0x15]] }
  0x57   : > { %3464 = sst [smem:[#allocation39_spill]] %s1998_s0  ;;  %s2012_s24 = sld [smem:[#allocation6 + $0x16]] }
  0x58   : > { %3465 = sst [smem:[#allocation40_spill]] %s2000_s1  ;;  %s2014_s12 = sld [smem:[#allocation6 + $0x17]] }
  0x59   : > { %3466 = sst [smem:[#allocation41_spill]] %s2004_s16  ;;  %s2016_s17 = sld [smem:[#allocation6 + $0x18]] }
  0x5a   : > { %3467 = sst [smem:[#allocation42_spill]] %s2006_s25  ;;  %s2018_s3 = sld [smem:[#allocation6 + $0x19]] }
  0x5b   : > { %3468 = sst [smem:[#allocation43_spill]] %s2008_s14  ;;  %s2020_s2 = sld [smem:[#allocation6 + $0x1a]] }
  0x5c   : > { %3469 = sst [smem:[#allocation44_spill]] %s2010_s13  ;;  %s2022_s22 = sld [smem:[#allocation6 + $0x1b]] }
  0x5d   : > { %3470 = sst [smem:[#allocation45_spill]] %s2012_s24  ;;  %s2024_s26 = sld [smem:[#allocation6 + $0x1c]] }
  0x5e   : > { %3471 = sst [smem:[#allocation46_spill]] %s2014_s12  ;;  %s2026_s16 = sld [smem:[#allocation6 + $0x1d]] }
  0x5f   : > { %s2028_s25 = sld [smem:[#allocation6 + $0x1e]]  ;;  %s2030_s14 = sld [smem:[#allocation6 + $0x1f]] }
  0x60   : > { %3472 = sst [smem:[#allocation47_spill]] %s2018_s3  ;;  %s2032_s13 = sld [smem:[#allocation6 + $0x20]] }
  0x61   : > { %3473 = sst [smem:[#allocation48_spill]] %s2020_s2  ;;  %s2034_s24 = sld [smem:[#allocation6 + $0x21]] }
  0x62   : > { %3474 = sst [smem:[#allocation49_spill]] %s2022_s22  ;;  %s2036_s12 = sld [smem:[#allocation6 + $0x22]] }
  0x63   : > { %3475 = sst [smem:[#allocation50_spill]] %s2024_s26  ;;  %s2038_s30 = sld [smem:[#allocation6 + $0x23]] }
  0x64   : > { %3476 = sst [smem:[#allocation51_spill]] %s2026_s16  ;;  %s2040_s28 = sld [smem:[#allocation6 + $0x24]] }
  0x65   : > { %3477 = sst [smem:[#allocation52_spill]] %s2028_s25  ;;  %s2042_s23 = sld [smem:[#allocation6 + $0x25]] }
  0x66   : > { %3478 = sst [smem:[#allocation53_spill]] %s2030_s14  ;;  %s2044_s22 = sld [smem:[#allocation6 + $0x26]] }
  0x67   : > { %3479 = sst [smem:[#allocation54_spill]] %s2032_s13  ;;  %s2046_s26 = sld [smem:[#allocation6 + $0x27]] }
  0x68   : > { %3480 = sst [smem:[#allocation55_spill]] %s2034_s24  ;;  %s2048_s16 = sld [smem:[#allocation6 + $0x28]] }
  0x69   : > { %3481 = sst [smem:[#allocation56_spill]] %s2036_s12  ;;  %s2050_s25 = sld [smem:[#allocation6 + $0x29]] }
  0x6a   : > { %3482 = sst [smem:[#allocation57_spill]] %s2038_s30  ;;  %s2052_s14 = sld [smem:[#allocation6 + $0x2a]] }
  0x6b   : > { %3483 = sst [smem:[#allocation58_spill]] %s2040_s28  ;;  %s2054_s13 = sld [smem:[#allocation6 + $0x2b]] }
  0x6c   : > { %3484 = sst [smem:[#allocation59_spill]] %s2042_s23  ;;  %s2056_s24 = sld [smem:[#allocation6 + $0x2c]] }
  0x6d   : > { %3485 = sst [smem:[#allocation60_spill]] %s2044_s22  ;;  %s2058_s12 = sld [smem:[#allocation6 + $0x2d]] }
  0x6e   : > { %3486 = sst [smem:[#allocation61_spill]] %s2046_s26  ;;  %s2060_s30 = sld [smem:[#allocation6 + $0x2e]] }
  0x6f   : > { %3487 = sst [smem:[#allocation62_spill]] %s2048_s16  ;;  %s2062_s28 = sld [smem:[#allocation6 + $0x2f]] }
  0x70   : > { %3488 = sst [smem:[#allocation63_spill]] %s2050_s25  ;;  %s2064_s23 = sld [smem:[#allocation6 + $0x30]] }
  0x71   : > { %3489 = sst [smem:[#allocation64_spill]] %s2052_s14  ;;  %s2066_s22 = sld [smem:[#allocation6 + $0x31]] }
  0x72   : > { %3490 = sst [smem:[#allocation65_spill]] %s2054_s13  ;;  %s2068_s26 = sld [smem:[#allocation6 + $0x32]] }
  0x73   : > { %3491 = sst [smem:[#allocation66_spill]] %s2056_s24  ;;  %s2070_s16 = sld [smem:[#allocation6 + $0x33]] }
  0x74   : > { %3492 = sst [smem:[#allocation67_spill]] %s2058_s12  ;;  %s2072_s25 = sld [smem:[#allocation6 + $0x34]] }
  0x75   : > { %3493 = sst [smem:[#allocation68_spill]] %s2060_s30  ;;  %s2074_s14 = sld [smem:[#allocation6 + $0x35]] }
  0x76   : > { %3494 = sst [smem:[#allocation69_spill]] %s2062_s28  ;;  %s2076_s13 = sld [smem:[#allocation6 + $0x36]] }
  0x77   : > { %3495 = sst [smem:[#allocation70_spill]] %s2064_s23  ;;  %s2078_s24 = sld [smem:[#allocation6 + $0x37]] }
  0x78   : > { %3496 = sst [smem:[#allocation71_spill]] %s2066_s22  ;;  %s2080_s12 = sld [smem:[#allocation6 + $0x38]] }
  0x79   : > { %3497 = sst [smem:[#allocation72_spill]] %s2068_s26  ;;  %s2082_s28 = sld [smem:[#allocation6 + $0x39]] }
  0x7a   : > { %3498 = sst [smem:[#allocation73_spill]] %s2070_s16  ;;  %s2084_s23 = sld [smem:[#allocation6 + $0x3a]] }
  0x7b   : > { %3499 = sst [smem:[#allocation74_spill]] %s2072_s25  ;;  %s2086_s26 = sld [smem:[#allocation6 + $0x3b]] }
  0x7c   : > { %3500 = sst [smem:[#allocation75_spill]] %s2074_s14  ;;  %s2088_s22 = sld [smem:[#allocation6 + $0x3c]] }
  0x7d   : > { %3501 = sst [smem:[#allocation76_spill]] %s2076_s13  ;;  %s2090_s30 = sld [smem:[#allocation6 + $0x3d]] }
  0x7e   : > { %3502 = sst [smem:[#allocation77_spill]] %s2078_s24  ;;  %s2092_s25 = sld [smem:[#allocation6 + $0x3e]] }
  0x7f   : > { %3503 = sst [smem:[#allocation78_spill]] %s2080_s12  ;;  %s2094_s13 = sld [smem:[#allocation6 + $0x3f]] }
  0x80   : > { %3504 = sst [smem:[#allocation79_spill]] %s2082_s28  ;;  %s2096_s24 = sld [smem:[#allocation6 + $0x40]] }
  0x81   : > { %3505 = sst [smem:[#allocation80_spill]] %s2084_s23  ;;  %s2098_s12 = sld [smem:[#allocation6 + $0x41]] }
  0x82   : > { %3506 = sst [smem:[#allocation81_spill]] %s2086_s26  ;;  %s2100_s16 = sld [smem:[#allocation6 + $0x42]] }
  0x83   : > { %3507 = sst [smem:[#allocation82_spill]] %s2088_s22  ;;  %s2102_s28 = sld [smem:[#allocation6 + $0x43]] }
  0x84   : > { %3508 = sst [smem:[#allocation83_spill]] %s2090_s30  ;;  %s2104_s23 = sld [smem:[#allocation6 + $0x44]] }
  0x85   : > { %3509 = sst [smem:[#allocation84_spill]] %s2092_s25  ;;  %s2106_s14 = sld [smem:[#allocation6 + $0x45]] }
  0x86   : > { %3510 = sst [smem:[#allocation85_spill]] %s2094_s13  ;;  %s2108_s26 = sld [smem:[#allocation6 + $0x46]] }
  0x87   : > { %3511 = sst [smem:[#allocation86_spill]] %s2096_s24  ;;  %s2110_s22 = sld [smem:[#allocation6 + $0x47]] }
  0x88   : > { %3512 = sst [smem:[#allocation87_spill]] %s2098_s12  ;;  %s3513_s25 = sshll.u32 %s1948_s29, 10 }
  0x89   : > { %s2115_s21 = scalar_lea.vmem [#allocation7], %s3513_s25  ;;  %s3514_s13 = smov %s3513_s25 }
  0x8a   : > { %s2119_s24 = scalar_lea.vmem [#allocation8], %s3514_s13  ;;  %s2121_s12 = smov 0  }
  0x8b LB: >> { %v3515_v10 = vld [vmem:[#allocation30_spill] sm:$0xff]  ;;  %v3516_v11 = vld [vmem:[#allocation33_spill] sm:$0xff]  ;;  %v3517_v12 = vld [vmem:[#allocation34_spill] sm:$0xff]  ;;  %s3519_s4 = sld [smem:[#allocation23_spill]]  ;;  %v3520_v0 = vlaneseq  ;;  %s3381_s25 = sshll.u32 %s1817_s12, 3  ;;  %v329_v23 = vstv %s1966_s10  ;;  %v334_v24 = vstv %s1968_s11  ;;  %v324_v31 = vstv %s1972_s18  ;;  %s1817_s12 = sphi %s2121_s12, %s305_s12  }
  0x8c   : >> { %v3518_v13 = vld [vmem:[#allocation37_spill] sm:$0xff]  ;;  %s3521_s30 = sshll.u32 %s1805_s15, 8  ;;  %s3524_s0 = sld [smem:[#allocation39_spill]]  ;;  %v315_v20 = vmul.f32 %v3515_v10, %v3515_v10  ;;  %v316_v22 = vmul.f32 %v3516_v11, %v3516_v11  ;;  %v317_v25 = vmul.f32 %v3517_v12, %v3517_v12  ;;  %v330_v28 = vmul.f32 %v329_v23, %v3515_v10 }
  0x8d   : >> { %v309_v14 = vshrl.u32 %v3520_v0, 7  ;;  %s307_s13 = sadd.s32 %s3381_s25, %s3521_s30  ;;  %s3525_s1 = sld [smem:[#allocation40_spill]]  ;;  %v318_v26 = vmul.f32 %v3518_v13, %v3518_v13  ;;  %v331_v32 = vmul.f32 %v329_v23, %v3516_v11  ;;  %v332_v34 = vmul.f32 %v329_v23, %v3517_v12 }
  0x8e   : >> { %v310_v15 = vstv %s307_s13  ;;  %s3526_s5 = sld [smem:[#allocation24_spill]]  ;;  %s3527_s6 = sld [smem:[#allocation25_spill]]  ;;  %v333_v38 = vmul.f32 %v329_v23, %v3518_v13  ;;  %v410_v44 = vstv %s2002_s20  ;;  %v501_v52 = vstv %s2016_s17 }
  0x8f   : >> { %v311_v16 = vadd.s32 %v310_v15, %v309_v14  ;;  %s3529_s7 = sld [smem:[#allocation26_spill]]  ;;  %s3534_s2 = sld [smem:[#allocation48_spill]]  ;;  %v2187_v58 = vstv %s1960_s27  ;;  %v502_v1 = vmul.f32 %v501_v52, %v3515_v10  ;;  %v503_v14 = vmul.f32 %v501_v52, %v3516_v11 }
  0x90   : >> { %s3533_s3 = sld [smem:[#allocation47_spill]]  ;;  %s3535_s8 = sld [smem:[#allocation27_spill]] }
  0x91   : >> { %v2133_v17 = vstv %s3519_s4  ;;  %v312_v18 = vcvt.s32.f32 %v311_v16  ;;  %s3536_s9 = sld [smem:[#allocation28_spill]]  ;;  %s3537_s13 = sld [smem:[#allocation31_spill]] }
  0x92   : >> { %3522 = vst [vmem:[#allocation88_spill] sm:$0xff] %v2133_v17  ;;  %v415_v35 = vstv %s3524_s0  ;;  %s3538_s30 = sld [smem:[#allocation32_spill]]  ;;  %s3539_s25 = sld [smem:[#allocation35_spill]] }
  0x93   : >> { %v2136_v19 = vsub.f32 %v312_v18, %v2133_v17  ;;  %v420_v36 = vstv %s3525_s1  ;;  %v416_v47 = vmul.f32 %v415_v35, %v3515_v10  ;;  %v417_v51 = vmul.f32 %v415_v35, %v3516_v11  ;;  %s3540_s0 = sld [smem:[#allocation36_spill]]  ;;  %s3541_s1 = sld [smem:[#allocation38_spill]] }
  0x94   : >> { %v2167_v39 = vstv %s3526_s5  ;;  %v2170_v40 = vstv %s3527_s6  ;;  %v418_v55 = vmul.f32 %v415_v35, %v3517_v12  ;;  %v419_v59 = vmul.f32 %v415_v35, %v3518_v13  ;;  %s3544_s4 = sld [smem:[#allocation42_spill]]  ;;  %s3545_s5 = sld [smem:[#allocation43_spill]] }
  0x95   : >> { %3523 = vst [vmem:[#allocation89_spill] sm:$0xff] %v2136_v19  ;;  %v319_v21 = vmul.f32 %v2136_v19, %v2136_v19  ;;  %v335_v29 = vmul.f32 %v334_v24, %v2136_v19  ;;  %v2174_v43 = vstv %s3529_s7  ;;  %v421_v48 = vmul.f32 %v420_v36, %v2136_v19  ;;  %s3546_s6 = sld [smem:[#allocation55_spill]]  ;;  %s3547_s7 = sld [smem:[#allocation44_spill]] }
  0x96   : >> { %v506_v56 = vstv %s3533_s3  ;;  %v496_v60 = vstv %s3534_s2  ;;  %v505_v24 = vmul.f32 %v501_v52, %v3518_v13  ;;  %s3542_s2 = sld [smem:[#allocation57_spill]] }
  0x97   : >> { %v2150_v27 = vadd.f32 %v319_v21, %v315_v20  ;;  %v2154_v30 = vadd.f32 %v319_v21, %v316_v22  ;;  %v2158_v33 = vadd.f32 %v319_v21, %v317_v25  ;;  %v2163_v37 = vadd.f32 %v319_v21, %v318_v26  ;;  %s3543_s3 = sld [smem:[#allocation41_spill]] }
  0x98   : >> { %v336_v42 = vadd.f32 %v335_v29, %v330_v28  ;;  %v337_v46 = vadd.f32 %v335_v29, %v331_v32  ;;  %v338_v50 = vadd.f32 %v335_v29, %v332_v34  ;;  %v339_v54 = vadd.f32 %v335_v29, %v333_v38 }
  0x99   : >> { %3528 = vst [vmem:[#allocation90_spill] sm:$0xff] %v2150_v27  ;;  %3530 = vst [vmem:[#allocation91_spill] sm:$0xff] %v2154_v30  ;;  %v325_v41 = vadd.f32 %v324_v31, %v2150_v27  ;;  %v326_v45 = vadd.f32 %v324_v31, %v2154_v30  ;;  %v327_v49 = vadd.f32 %v324_v31, %v2158_v33  ;;  %v2200_v22 = vstv %s3535_s8  ;;  %s3548_s8 = sld [smem:[#allocation45_spill]] }
  0x9a   : >> { %3531 = vst [vmem:[#allocation92_spill] sm:$0xff] %v2158_v33  ;;  %3532 = vst [vmem:[#allocation93_spill] sm:$0xff] %v2163_v37  ;;  %v328_v53 = vadd.f32 %v324_v31, %v2163_v37  ;;  %v411_v62 = vadd.f32 %v410_v44, %v2150_v27  ;;  %v422_v63 = vadd.f32 %v421_v48, %v416_v47 }
  0x9b   : >> { %v340_v57 = vadd.f32 %v336_v42, %v325_v41  ;;  %v341_v61 = vadd.f32 %v337_v46, %v326_v45  ;;  %v342_v2 = vadd.f32 %v338_v50, %v327_v49  ;;  %v412_v3 = vadd.f32 %v410_v44, %v2154_v30 }
  0x9c   : >> { %v423_v4 = vadd.f32 %v421_v48, %v417_v51  ;;  %v507_v5 = vmul.f32 %v506_v56, %v2136_v19  ;;  %v343_v6 = vadd.f32 %v339_v54, %v328_v53  ;;  %v413_v7 = vadd.f32 %v410_v44, %v2158_v33 }
  0x9d   : >> { %v424_v9 = vadd.f32 %v421_v48, %v418_v55  ;;  %v344_v15 = vmax.f32 %v340_v57, 1e-09  ;;  %v414_v16 = vadd.f32 %v410_v44, %v2163_v37  ;;  %v425_v18 = vadd.f32 %v421_v48, %v419_v59 }
  0x9e   : >> { %v504_v20 = vmul.f32 %v501_v52, %v3517_v12  ;;  %v345_v21 = vmax.f32 %v341_v61, 1e-09  ;;  %v426_v23 = vadd.f32 %v422_v63, %v411_v62  ;;  %v346_v25 = vmax.f32 %v342_v2, 1e-09 }
  0x9f   : >> { %v427_v26 = vadd.f32 %v423_v4, %v412_v3  ;;  %v497_v28 = vadd.f32 %v496_v60, %v2150_v27  ;;  %v508_v29 = vadd.f32 %v507_v5, %v502_v1  ;;  %v347_v31 = vmax.f32 %v343_v6, 1e-09 }
  0xa0   : >> { %v428_v32 = vadd.f32 %v424_v9, %v413_v7  ;;  %v498_v34 = vadd.f32 %v496_v60, %v2154_v30  ;;  %v509_v35 = vadd.f32 %v507_v5, %v503_v14  ;;  %1575 = vrcp.f32 %v344_v15 }
  0xa1   : >> { %v429_v36 = vadd.f32 %v425_v18, %v414_v16  ;;  %v499_v38 = vadd.f32 %v496_v60, %v2158_v33  ;;  %v510_v41 = vadd.f32 %v507_v5, %v504_v20  ;;  %1577 = vrcp.f32 %v345_v21 }
  0xa2   : >> { %v2207_v42 = vstv %s3536_s9  ;;  %v430_v44 = vmax.f32 %v426_v23, 1e-09  ;;  %v2210_v45 = vstv %s1974_s19  ;;  %v431_v46 = vmax.f32 %v427_v26, 1e-09  ;;  %s3549_s9 = sld [smem:[#allocation46_spill]] }
  0xa3   : >> { %v500_v47 = vadd.f32 %v496_v60, %v2163_v37  ;;  %v511_v48 = vadd.f32 %v507_v5, %v505_v24  ;;  %v512_v49 = vadd.f32 %v508_v29, %v497_v28  ;;  %1579 = vrcp.f32 %v346_v25 }
  0xa4   : >> { %v432_v50 = vmax.f32 %v428_v32, 1e-09  ;;  %v2214_v51 = vstv %s3537_s13  ;;  %v513_v52 = vadd.f32 %v509_v35, %v498_v34  ;;  %1581 = vrcp.f32 %v347_v31  ;;  %s3600_s13 = sld [smem:[#allocation59_spill]] }
  0xa5   : >> { %v433_v53 = vmax.f32 %v429_v36, 1e-09  ;;  %v2217_v54 = vstv %s3538_s30  ;;  %v514_v55 = vadd.f32 %v510_v41, %v499_v38  ;;  %1583 = vrcp.f32 %v430_v44  ;;  %s3597_s30 = sld [smem:[#allocation75_spill]] }
  0xa6   : >> { %v2220_v56 = vstv %s3539_s25  ;;  %v2223_v57 = vstv %s3540_s0  ;;  %v2226_v59 = vstv %s3541_s1  ;;  %1585 = vrcp.f32 %v431_v46  ;;  %s3553_s0 = sld [smem:[#allocation56_spill]]  ;;  %s3556_s1 = sld [smem:[#allocation49_spill]] }
  0xa7   : >> { %v2228_v60 = vadd.f32 %v511_v48, %v500_v47  ;;  %v516_v61 = vmax.f32 %v512_v49, 1e-09  ;;  %v582_v62 = vstv %s3542_s2  ;;  %1587 = vrcp.f32 %v432_v50  ;;  %s3573_s2 = sld [smem:[#allocation64_spill]]  ;;  %s3599_s25 = sld [smem:[#allocation58_spill]] }
  0xa8   : >> { %v517_v63 = vmax.f32 %v513_v52, 1e-09  ;;  %v2232_v1 = vstv %s3543_s3  ;;  %v2235_v2 = vstv %s3544_s4  ;;  %1589 = vrcp.f32 %v433_v53  ;;  %s3574_s3 = sld [smem:[#allocation65_spill]]  ;;  %s3578_s4 = sld [smem:[#allocation50_spill]] }
  0xa9   : >> { %v518_v3 = vmax.f32 %v514_v55, 1e-09  ;;  %v2238_v4 = vstv %s3545_s5  ;;  %v587_v5 = vstv %s3546_s6  ;;  %v2242_v6 = vstv %s3547_s7  ;;  %s3581_s5 = sld [smem:[#allocation66_spill]]  ;;  %s3591_s6 = sld [smem:[#allocation51_spill]] }
  0xaa   : >> { %3550 = vst [vmem:[#allocation94_spill] sm:$0xff] %v2238_v4  ;;  %3551 = vst [vmem:[#allocation95_spill] sm:$0xff] %v2242_v6  ;;  %v2245_v7 = vstv %s3548_s8  ;;  %v2248_v9 = vstv %s3549_s9  ;;  %v2251_v14 = vadd.f32 %v582_v62, %v2150_v27  ;;  %v1576_v15 = vpop.eup %1575  ;;  %1591 = vrcp.f32 %v516_v61  ;;  %s3593_s7 = sld [smem:[#allocation52_spill]]  ;;  %s3594_s8 = sld [smem:[#allocation53_spill]] }
  0xab   : >> { %3552 = vst [vmem:[#allocation96_spill] sm:$0xff] %v2245_v7  ;;  %3554 = vst [vmem:[#allocation97_spill] sm:$0xff] %v2248_v9  ;;  %v2255_v18 = vadd.f32 %v582_v62, %v2154_v30  ;;  %v2258_v20 = vadd.f32 %v582_v62, %v2158_v33  ;;  %v1578_v21 = vpop.eup %1577  ;;  %1593 = vrcp.f32 %v517_v63  ;;  %v2261_v23 = vadd.f32 %v582_v62, %v2163_v37  ;;  %s3596_s9 = sld [smem:[#allocation54_spill]] }
  0xac   : >> { %3555 = vst [vmem:[#allocation98_spill] sm:$0xff] %v2251_v14  ;;  %v2264_v24 = vmul.f32 %v587_v5, %v3515_v10  ;;  %v2267_v25 = vmul.f32 %v587_v5, %v3516_v11  ;;  %1595 = vrcp.f32 %v518_v3  ;;  %v2270_v26 = vmul.f32 %v587_v5, %v3517_v12 }
  0xad   : >> { %3557 = vst [vmem:[#allocation99_spill] sm:$0xff] %v2255_v18  ;;  %3558 = vst [vmem:[#allocation100_spill] sm:$0xff] %v2258_v20  ;;  %v2273_v28 = vmul.f32 %v587_v5, %v3518_v13  ;;  %v1580_v31 = vpop.eup %1579  ;;  %v357_v32 = vmul.f32 %v1576_v15, %v2167_v39  ;;  %v366_v34 = vmul.f32 %v1576_v15, %v2170_v40  ;;  %v2280_v36 = vstv %s3556_s1  ;;  %s3601_s1 = sld [smem:[#allocation60_spill]] }
  0xae   : >> { %3559 = vst [vmem:[#allocation101_spill] sm:$0xff] %v2261_v23  ;;  %3560 = vst [vmem:[#allocation102_spill] sm:$0xff] %v2264_v24  ;;  %v375_v35 = vmul.f32 %v1576_v15, %v2174_v43  ;;  %v1582_v38 = vpop.eup %1581  ;;  %v358_v41 = vmul.f32 %v1578_v21, %v2167_v39  ;;  %v367_v44 = vmul.f32 %v1578_v21, %v2170_v40 }
  0xaf   : >> { %3561 = vst [vmem:[#allocation103_spill] sm:$0xff] %v2267_v25  ;;  %3562 = vst [vmem:[#allocation104_spill] sm:$0xff] %v2270_v26  ;;  %v376_v46 = vmul.f32 %v1578_v21, %v2174_v43  ;;  %v384_v47 = vmul.f32 %v1576_v15, %v2187_v58  ;;  %v1584_v48 = vpop.eup %1583  ;;  %v359_v49 = vmul.f32 %v1580_v31, %v2167_v39 }
  0xb0   : >> { %3563 = vst [vmem:[#allocation105_spill] sm:$0xff] %v2273_v28  ;;  %3564 = vst [vmem:[#allocation106_spill] sm:$0xff] %v2280_v36  ;;  %v368_v50 = vmul.f32 %v1580_v31, %v2170_v40  ;;  %v377_v52 = vmul.f32 %v1580_v31, %v2174_v43  ;;  %v385_v53 = vmul.f32 %v1578_v21, %v2187_v58  ;;  %v1586_v55 = vpop.eup %1585 }
  0xb1   : >> { %v360_v61 = vmul.f32 %v1582_v38, %v2167_v39  ;;  %v369_v62 = vmul.f32 %v1582_v38, %v2170_v40  ;;  %v378_v63 = vmul.f32 %v1582_v38, %v2174_v43  ;;  %v386_v3 = vmul.f32 %v1580_v31, %v2187_v58  ;;  %v1588_v5 = vpop.eup %1587 }
  0xb2   : >> { %v387_v0 = vmul.f32 %v1582_v38, %v2187_v58  ;;  %v393_v29 = vmul.f32 %v1576_v15, %v2200_v22  ;;  %v394_v16 = vmul.f32 %v1578_v21, %v2200_v22  ;;  %v395_v17 = vmul.f32 %v1580_v31, %v2200_v22  ;;  %v1590_v8 = vpop.eup %1589 }
  0xb3   : >> { %v396_v36 = vmul.f32 %v1582_v38, %v2200_v22  ;;  %v443_v39 = vmul.f32 %v1584_v48, %v2210_v45  ;;  %v444_v40 = vmul.f32 %v1586_v55, %v2210_v45  ;;  %v445_v43 = vmul.f32 %v1588_v5, %v2210_v45 }
  0xb4   : >> { %v402_v37 = vmul.f32 %v1576_v15, %v2207_v42  ;;  %v403_v33 = vmul.f32 %v1578_v21, %v2207_v42  ;;  %v404_v58 = vmul.f32 %v1580_v31, %v2207_v42  ;;  %v446_v30 = vmul.f32 %v1590_v8, %v2210_v45  ;;  %v2306_v27 = vpop.eup %1591 }
  0xb5   : >> { %v405_v13 = vmul.f32 %v1582_v38, %v2207_v42  ;;  %v438_v12 = vadd.f32 %v1584_v48, %v1576_v15  ;;  %v452_v22 = vmul.f32 %v1584_v48, %v2214_v51  ;;  %v453_v11 = vmul.f32 %v1586_v55, %v2214_v51  ;;  %v2311_v10 = vpop.eup %1593 }
  0xb6   : >> { %v439_v23 = vadd.f32 %v1586_v55, %v1578_v21  ;;  %v440_v20 = vadd.f32 %v1588_v5, %v1580_v31  ;;  %v454_v18 = vmul.f32 %v1588_v5, %v2214_v51  ;;  %v455_v14 = vmul.f32 %v1590_v8, %v2214_v51  ;;  %v2315_v28 = vpop.eup %1595 }
  0xb7   : >> { %v2317_v45 = vadd.f32 %v1590_v8, %v1582_v38  ;;  %v447_v9 = vadd.f32 %v443_v39, %v357_v32  ;;  %v448_v26 = vadd.f32 %v444_v40, %v358_v41  ;;  %v449_v42 = vadd.f32 %v445_v43, %v359_v49 }
  0xb8   : >> { %v2319_v15 = vadd.f32 %v446_v30, %v360_v61  ;;  %v461_v25 = vmul.f32 %v1584_v48, %v2217_v54  ;;  %v462_v24 = vmul.f32 %v1586_v55, %v2217_v54  ;;  %v463_v21 = vmul.f32 %v1588_v5, %v2217_v54 }
  0xb9   : >> { %v456_v31 = vadd.f32 %v452_v22, %v366_v34  ;;  %v457_v7 = vadd.f32 %v453_v11, %v367_v44  ;;  %v464_v6 = vmul.f32 %v1590_v8, %v2217_v54  ;;  %v470_v51 = vmul.f32 %v1584_v48, %v2220_v56 }
  0xba   : >> { %v458_v4 = vadd.f32 %v454_v18, %v368_v50  ;;  %v2326_v38 = vadd.f32 %v455_v14, %v369_v62  ;;  %v471_v32 = vmul.f32 %v1586_v55, %v2220_v56  ;;  %v472_v30 = vmul.f32 %v1588_v5, %v2220_v56 }
  0xbb   : >> { %v473_v41 = vmul.f32 %v1590_v8, %v2220_v56  ;;  %v479_v49 = vmul.f32 %v1584_v48, %v2223_v57  ;;  %v480_v61 = vmul.f32 %v1586_v55, %v2223_v57  ;;  %v481_v34 = vmul.f32 %v1588_v5, %v2223_v57 }
  0xbc   : >> { %3565 = vst [vmem:[#allocation107_spill] sm:$0xff] %v2326_v38  ;;  %v465_v11 = vadd.f32 %v461_v25, %v375_v35  ;;  %v466_v44 = vadd.f32 %v462_v24, %v376_v46  ;;  %v467_v54 = vadd.f32 %v463_v21, %v377_v52  ;;  %v482_v39 = vmul.f32 %v1590_v8, %v2223_v57 }
  0xbd   : >> { %v2335_v18 = vadd.f32 %v464_v6, %v378_v63  ;;  %v474_v14 = vadd.f32 %v470_v51, %v384_v47  ;;  %v488_v50 = vmul.f32 %v1584_v48, %v2226_v59  ;;  %v489_v62 = vmul.f32 %v1586_v55, %v2226_v59  ;;  %v3570_v51 = vld [vmem:[#allocation96_spill] sm:$0xff] }
  0xbe   : >> { %v475_v40 = vadd.f32 %v471_v32, %v385_v53  ;;  %v476_v56 = vadd.f32 %v472_v30, %v386_v3  ;;  %v490_v43 = vmul.f32 %v1588_v5, %v2226_v59  ;;  %v491_v22 = vmul.f32 %v1590_v8, %v2226_v59  ;;  %v3571_v30 = vld [vmem:[#allocation102_spill] sm:$0xff] }
  0xbf   : >> { %v2341_v38 = vadd.f32 %v473_v41, %v387_v0  ;;  %v483_v24 = vadd.f32 %v479_v49, %v393_v29  ;;  %v484_v25 = vadd.f32 %v480_v61, %v394_v16  ;;  %v485_v35 = vadd.f32 %v481_v34, %v395_v17  ;;  %v3572_v61 = vld [vmem:[#allocation103_spill] sm:$0xff] }
  0xc0   : >> { %v2343_v57 = vadd.f32 %v482_v39, %v396_v36  ;;  %v3566_v6 = vmax.f32 %v2228_v60, 1e-09  ;;  %v529_v46 = vmul.f32 %v2306_v27, %v2232_v1  ;;  %v530_v47 = vmul.f32 %v2311_v10, %v2232_v1 }
  0xc1   : >> { %v492_v48 = vadd.f32 %v488_v50, %v402_v37  ;;  %v2351_v52 = vadd.f32 %v489_v62, %v403_v33  ;;  %v531_v0 = vmul.f32 %v2315_v28, %v2232_v1  ;;  %v538_v8 = vmul.f32 %v2306_v27, %v2235_v2 }
  0xc2   : >> { %1597 = vrcp.f32 %v3566_v6  ;;  %v2357_v17 = vadd.f32 %v490_v43, %v404_v58  ;;  %v2359_v59 = vadd.f32 %v491_v22, %v405_v13  ;;  %v2362_v60 = vadd.f32 %v2306_v27, %v438_v12  ;;  %v3568_v12 = vld [vmem:[#allocation94_spill] sm:$0xff]  ;;  %v3569_v58 = vld [vmem:[#allocation95_spill] sm:$0xff]  ;;  %v3575_v43 = vld [vmem:[#allocation104_spill] sm:$0xff] }
  0xc3   : >> { %v3567_v16 = vstv %s3553_s0  ;;  %v2368_v37 = vadd.f32 %v2311_v10, %v439_v23  ;;  %v2371_v33 = vadd.f32 %v2315_v28, %v440_v20  ;;  %v539_v36 = vmul.f32 %v2311_v10, %v2235_v2  ;;  %v3576_v6 = vld [vmem:[#allocation97_spill] sm:$0xff]  ;;  %s3608_s0 = sld [smem:[#allocation74_spill]] }
  0xc4   : >> { %v593_v29 = vmul.f32 %v3567_v16, %v2136_v19  ;;  %v540_v53 = vmul.f32 %v2315_v28, %v2235_v2  ;;  %v2377_v13 = vadd.f32 %v529_v46, %v447_v9  ;;  %v2379_v55 = vadd.f32 %v530_v47, %v448_v26  ;;  %v3577_v47 = vld [vmem:[#allocation105_spill] sm:$0xff] }
  0xc5   : >> { %v547_v63 = vmul.f32 %v2306_v27, %v3568_v12  ;;  %v548_v23 = vmul.f32 %v2311_v10, %v3568_v12  ;;  %v2385_v3 = vadd.f32 %v531_v0, %v449_v42  ;;  %v2387_v20 = vadd.f32 %v538_v8, %v456_v31 }
  0xc6   : >> { %v549_v5 = vmul.f32 %v2315_v28, %v3568_v12  ;;  %v556_v21 = vmul.f32 %v2306_v27, %v3569_v58  ;;  %v557_v9 = vmul.f32 %v2311_v10, %v3569_v58  ;;  %v558_v26 = vmul.f32 %v2315_v28, %v3569_v58 }
  0xc7   : >> { %v565_v32 = vmul.f32 %v2306_v27, %v3570_v51  ;;  %v594_v42 = vadd.f32 %v593_v29, %v3571_v30  ;;  %v2400_v41 = vadd.f32 %v539_v36, %v457_v7  ;;  %v2402_v31 = vadd.f32 %v540_v53, %v458_v4  ;;  %v3579_v36 = vld [vmem:[#allocation98_spill] sm:$0xff] }
  0xc8   : >> { %v566_v49 = vmul.f32 %v2311_v10, %v3570_v51  ;;  %v595_v34 = vadd.f32 %v593_v29, %v3572_v61  ;;  %v2407_v39 = vadd.f32 %v547_v63, %v465_v11  ;;  %v2409_v50 = vadd.f32 %v548_v23, %v466_v44 }
  0xc9   : >> { %v567_v62 = vmul.f32 %v2315_v28, %v3570_v51  ;;  %v596_v22 = vadd.f32 %v593_v29, %v3575_v43  ;;  %v2414_v7 = vadd.f32 %v549_v5, %v467_v54  ;;  %v2416_v4 = vadd.f32 %v556_v21, %v474_v14  ;;  %v3580_v54 = vld [vmem:[#allocation99_spill] sm:$0xff]  ;;  %v3585_v43 = vld [vmem:[#allocation33_spill] sm:$0xff] }
  0xca   : >> { %v574_v46 = vmul.f32 %v2306_v27, %v3576_v6  ;;  %v597_v0 = vadd.f32 %v593_v29, %v3577_v47  ;;  %v2421_v11 = vadd.f32 %v557_v9, %v475_v40  ;;  %v2423_v44 = vadd.f32 %v558_v26, %v476_v56  ;;  %v3582_v56 = vld [vmem:[#allocation100_spill] sm:$0xff]  ;;  %v3583_v9 = vld [vmem:[#allocation101_spill] sm:$0xff] }
  0xcb   : >> { %v2425_v16 = vadd.f32 %v565_v32, %v483_v24  ;;  %v598_v53 = vadd.f32 %v594_v42, %v3579_v36  ;;  %v2428_v63 = vadd.f32 %v566_v49, %v484_v25  ;;  %v599_v14 = vadd.f32 %v595_v34, %v3580_v54  ;;  %v3584_v42 = vld [vmem:[#allocation30_spill] sm:$0xff] }
  0xcc   : >> { %v1598_v8 = vpop.eup %1597  ;;  %v673_v23 = vstv %s3573_s2  ;;  %v678_v5 = vstv %s3574_s3  ;;  %v2433_v27 = vadd.f32 %v567_v62, %v485_v35  ;;  %v575_v29 = vmul.f32 %v2311_v10, %v3576_v6  ;;  %s3602_s2 = sld [smem:[#allocation61_spill]]  ;;  %s3604_s3 = sld [smem:[#allocation62_spill]] }
  0xcd   : >> { %v576_v40 = vmul.f32 %v2315_v28, %v3576_v6  ;;  %v600_v24 = vadd.f32 %v596_v22, %v3582_v56  ;;  %v2441_v21 = vadd.f32 %v1598_v8, %v2317_v45  ;;  %v2443_v25 = vadd.f32 %v574_v46, %v492_v48  ;;  %v3586_v46 = vld [vmem:[#allocation34_spill] sm:$0xff]  ;;  %v3590_v56 = vld [vmem:[#allocation107_spill] sm:$0xff] }
  0xce   : >> { %v601_v26 = vadd.f32 %v597_v0, %v3583_v9  ;;  %v2447_v32 = vstv %s3578_s4  ;;  %v532_v35 = vmul.f32 %v1598_v8, %v2232_v1  ;;  %v602_v30 = vmax.f32 %v598_v53, 1e-09  ;;  %v3587_v53 = vld [vmem:[#allocation37_spill] sm:$0xff]  ;;  %s3605_s4 = sld [smem:[#allocation73_spill]] }
  0xcf   : >> { %v674_v49 = vmul.f32 %v673_v23, %v3584_v42  ;;  %v679_v10 = vmul.f32 %v678_v5, %v2136_v19  ;;  %v541_v28 = vmul.f32 %v1598_v8, %v2235_v2  ;;  %v550_v61 = vmul.f32 %v1598_v8, %v3568_v12  ;;  %v3589_v12 = vld [vmem:[#allocation90_spill] sm:$0xff] }
  0xd0   : >> { %v603_v34 = vmax.f32 %v599_v14, 1e-09  ;;  %v668_v45 = vstv %s3581_s5  ;;  %v559_v48 = vmul.f32 %v1598_v8, %v3569_v58  ;;  %v604_v62 = vmax.f32 %v600_v24, 1e-09  ;;  %s3607_s5 = sld [smem:[#allocation63_spill]] }
  0xd1   : >> { %v675_v22 = vmul.f32 %v673_v23, %v3585_v43  ;;  %v676_v47 = vmul.f32 %v673_v23, %v3586_v46  ;;  %v568_v1 = vmul.f32 %v1598_v8, %v3570_v51  ;;  %v577_v0 = vmul.f32 %v1598_v8, %v3576_v6  ;;  %v3592_v51 = vld [vmem:[#allocation91_spill] sm:$0xff]  ;;  %v3595_v8 = vld [vmem:[#allocation92_spill] sm:$0xff] }
  0xd2   : >> { %v605_v36 = vmax.f32 %v601_v26, 1e-09  ;;  %v677_v54 = vmul.f32 %v673_v23, %v3587_v53  ;;  %v2462_v2 = vadd.f32 %v575_v29, %v2351_v52  ;;  %1599 = vrcp.f32 %v602_v30 }
  0xd3   : >> { %v669_v14 = vadd.f32 %v668_v45, %v3589_v12  ;;  %v680_v5 = vadd.f32 %v679_v10, %v674_v49  ;;  %v2466_v58 = vadd.f32 %v532_v35, %v2319_v15  ;;  %v2469_v24 = vadd.f32 %v541_v28, %v3590_v56  ;;  %v3598_v15 = vld [vmem:[#allocation93_spill] sm:$0xff] }
  0xd4   : >> { %3588 = vst [vmem:[#allocation94_spill] sm:$0xff] %v2462_v2  ;;  %1601 = vrcp.f32 %v603_v34  ;;  %v670_v6 = vadd.f32 %v668_v45, %v3592_v51  ;;  %v671_v52 = vadd.f32 %v668_v45, %v3595_v8  ;;  %v681_v23 = vadd.f32 %v679_v10, %v675_v22 }
  0xd5   : >> { %1603 = vrcp.f32 %v604_v62  ;;  %v682_v29 = vadd.f32 %v679_v10, %v676_v47  ;;  %v2474_v9 = vadd.f32 %v550_v61, %v2335_v18  ;;  %v672_v26 = vadd.f32 %v668_v45, %v3598_v15 }
  0xd6   : >> { %1605 = vrcp.f32 %v605_v36  ;;  %v683_v35 = vadd.f32 %v679_v10, %v677_v54  ;;  %v2478_v30 = vadd.f32 %v559_v48, %v2341_v38  ;;  %v2481_v49 = vadd.f32 %v568_v1, %v2343_v57 }
  0xd7   : >> { %v2484_v28 = vadd.f32 %v576_v40, %v2357_v17  ;;  %v684_v18 = vadd.f32 %v680_v5, %v669_v14  ;;  %v2487_v61 = vadd.f32 %v577_v0, %v2359_v59  ;;  %v632_v34 = vstv %s3591_s6  ;;  %s3613_s6 = sld [smem:[#allocation67_spill]] }
  0xd8   : >> { %v641_v10 = vstv %s3593_s7  ;;  %v2492_v45 = vstv %s3594_s8  ;;  %v2495_v38 = vstv %s3596_s9  ;;  %v2497_v57 = vadd.f32 %v681_v23, %v670_v6  ;;  %s3615_s7 = sld [smem:[#allocation68_spill]]  ;;  %s3629_s8 = sld [smem:[#allocation69_spill]] }
  0xd9   : >> { %3603 = vst [vmem:[#allocation95_spill] sm:$0xff] %v2484_v28  ;;  %3606 = vst [vmem:[#allocation96_spill] sm:$0xff] %v2487_v61  ;;  %v2499_v48 = vadd.f32 %v682_v29, %v671_v52  ;;  %v754_v17 = vstv %s3597_s30  ;;  %v2502_v40 = vadd.f32 %v683_v35, %v672_v26  ;;  %v2505_v62 = vstv %s3599_s25  ;;  %v3617_v61 = vld [vmem:[#allocation106_spill] sm:$0xff]  ;;  %s3632_s9 = sld [smem:[#allocation70_spill]]  ;;  %s3634_s30 = sld [smem:[#allocation71_spill]] }
  0xda   : >> { %v2508_v22 = vstv %s3600_s13  ;;  %v2511_v59 = vstv %s3601_s1  ;;  %v688_v47 = vmax.f32 %v684_v18, 1e-09  ;;  %v2514_v1 = vstv %s3602_s2  ;;  %s3635_s25 = sld [smem:[#allocation72_spill]]  ;;  %s3637_s13 = sld [smem:[#allocation82_spill]] }
  0xdb   : >> { %3609 = vst [vmem:[#allocation102_spill] sm:$0xff] %v2514_v1  ;;  %v2517_v0 = vstv %s3604_s3  ;;  %v759_v36 = vstv %s3605_s4  ;;  %v2521_v54 = vstv %s3607_s5  ;;  %v2524_v14 = vadd.f32 %v754_v17, %v3589_v12  ;;  %s3650_s1 = sld [smem:[#allocation83_spill]]  ;;  %s3657_s2 = sld [smem:[#allocation76_spill]] }
  0xdc   : >> { %3610 = vst [vmem:[#allocation103_spill] sm:$0xff] %v2517_v0  ;;  %3611 = vst [vmem:[#allocation104_spill] sm:$0xff] %v2521_v54  ;;  %v2527_v5 = vadd.f32 %v754_v17, %v3592_v51  ;;  %v764_v56 = vstv %s3608_s0  ;;  %v1600_v6 = vpop.eup %1599  ;;  %v689_v52 = vmax.f32 %v2497_v57, 1e-09  ;;  %v690_v23 = vmax.f32 %v2499_v48, 1e-09 }
  0xdd   : >> { %v2533_v29 = vadd.f32 %v754_v17, %v3595_v8  ;;  %v2536_v26 = vadd.f32 %v754_v17, %v3598_v15  ;;  %v760_v51 = vmul.f32 %v759_v36, %v3584_v42  ;;  %v761_v12 = vmul.f32 %v759_v36, %v3585_v43  ;;  %s3624_s0 = sld [smem:[#allocation84_spill]]  ;;  %s3658_s3 = sld [smem:[#allocation77_spill]] }
  0xde   : >> { %3612 = vst [vmem:[#allocation97_spill] sm:$0xff] %v2527_v5  ;;  %v1602_v35 = vpop.eup %1601  ;;  %v762_v5 = vmul.f32 %v759_v36, %v3586_v46  ;;  %v615_v48 = vmul.f32 %v1600_v6, %v3617_v61  ;;  %1607 = vrcp.f32 %v688_v47  ;;  %v763_v8 = vmul.f32 %v759_v36, %v3587_v53  ;;  %s3659_s4 = sld [smem:[#allocation78_spill]]  ;;  %s3661_s5 = sld [smem:[#allocation79_spill]] }
  0xdf   : >> { %3614 = vst [vmem:[#allocation105_spill] sm:$0xff] %v2533_v29  ;;  %3616 = vst [vmem:[#allocation98_spill] sm:$0xff] %v2536_v26  ;;  %v1604_v57 = vpop.eup %1603  ;;  %v765_v29 = vmul.f32 %v764_v56, %v2136_v19  ;;  %v616_v17 = vmul.f32 %v1602_v35, %v3617_v61  ;;  %v2548_v18 = vstv %s3613_s6  ;;  %v2551_v42 = vstv %s3615_s7  ;;  %s3664_s6 = sld [smem:[#allocation80_spill]]  ;;  %s3665_s7 = sld [smem:[#allocation81_spill]] }
  0xe0   : >> { %v1606_v28 = vpop.eup %1605  ;;  %v617_v15 = vmul.f32 %v1604_v57, %v3617_v61  ;;  %3618 = vst [vmem:[#allocation99_spill] sm:$0xff] %v2548_v18  ;;  %3619 = vst [vmem:[#allocation100_spill] sm:$0xff] %v2551_v42  ;;  %v2554_v43 = vadd.f32 %v1600_v6, %v2362_v60  ;;  %v2557_v46 = vadd.f32 %v1602_v35, %v2368_v37  ;;  %1609 = vrcp.f32 %v689_v52 }
  0xe1   : >> { %v624_v47 = vmul.f32 %v1600_v6, %v2447_v32  ;;  %v633_v36 = vmul.f32 %v1600_v6, %v632_v34  ;;  %v2561_v56 = vadd.f32 %v1604_v57, %v2371_v33  ;;  %v625_v53 = vmul.f32 %v1602_v35, %v2447_v32 }
  0xe2   : >> { %3620 = vst [vmem:[#allocation101_spill] sm:$0xff] %v2554_v43  ;;  %3621 = vst [vmem:[#allocation107_spill] sm:$0xff] %v2557_v46  ;;  %v626_v19 = vmul.f32 %v1604_v57, %v2447_v32  ;;  %v634_v26 = vmul.f32 %v1602_v35, %v632_v34  ;;  %v2566_v18 = vadd.f32 %v1606_v28, %v2441_v21  ;;  %1611 = vrcp.f32 %v690_v23 }
  0xe3   : >> { %3622 = vst [vmem:[#allocation106_spill] sm:$0xff] %v2561_v56  ;;  %v618_v60 = vmul.f32 %v1606_v28, %v3617_v61  ;;  %v619_v42 = vadd.f32 %v615_v48, %v2377_v13  ;;  %v627_v37 = vmul.f32 %v1606_v28, %v2447_v32  ;;  %v2572_v46 = vadd.f32 %v616_v17, %v2379_v55  ;;  %v3626_v23 = vld [vmem:[#allocation103_spill] sm:$0xff] }
  0xe4   : >> { %v2575_v33 = vadd.f32 %v617_v15, %v2385_v3  ;;  %v635_v56 = vmul.f32 %v1604_v57, %v632_v34  ;;  %v636_v43 = vmul.f32 %v1606_v28, %v632_v34  ;;  %v642_v2 = vmul.f32 %v1600_v6, %v641_v10 }
  0xe5   : >> { %v643_v54 = vmul.f32 %v1602_v35, %v641_v10  ;;  %v644_v0 = vmul.f32 %v1604_v57, %v641_v10  ;;  %v645_v1 = vmul.f32 %v1606_v28, %v641_v10  ;;  %v628_v21 = vadd.f32 %v624_v47, %v2387_v20  ;;  %v3636_v17 = vld [vmem:[#allocation97_spill] sm:$0xff] }
  0xe6   : >> { %v2579_v61 = vadd.f32 %v625_v53, %v2400_v41  ;;  %v2582_v13 = vadd.f32 %v626_v19, %v2402_v31  ;;  %v651_v55 = vmul.f32 %v1600_v6, %v2492_v45  ;;  %v2586_v32 = vadd.f32 %v618_v60, %v2466_v58  ;;  %v3639_v60 = vld [vmem:[#allocation98_spill] sm:$0xff] }
  0xe7   : >> { %v2589_v3 = vadd.f32 %v627_v37, %v2469_v24  ;;  %v637_v15 = vadd.f32 %v633_v36, %v2407_v39  ;;  %v652_v34 = vmul.f32 %v1602_v35, %v2492_v45  ;;  %v2594_v20 = vadd.f32 %v634_v26, %v2409_v50  ;;  %v3627_v26 = vld [vmem:[#allocation104_spill] sm:$0xff]  ;;  %v3638_v36 = vld [vmem:[#allocation105_spill] sm:$0xff] }
  0xe8   : >> { %v2597_v41 = vadd.f32 %v635_v56, %v2414_v7  ;;  %v2600_v19 = vadd.f32 %v636_v43, %v2474_v9  ;;  %v653_v31 = vmul.f32 %v1604_v57, %v2492_v45  ;;  %v1608_v53 = vpop.eup %1607  ;;  %v646_v58 = vadd.f32 %v642_v2, %v2416_v4 }
  0xe9   : >> { %v2605_v24 = vadd.f32 %v643_v54, %v2421_v11  ;;  %v2608_v39 = vadd.f32 %v644_v0, %v2423_v44  ;;  %v2611_v50 = vadd.f32 %v645_v1, %v2478_v30  ;;  %v654_v7 = vmul.f32 %v1606_v28, %v2492_v45 }
  0xea   : >> { %v655_v10 = vadd.f32 %v651_v55, %v2425_v16  ;;  %v766_v43 = vadd.f32 %v765_v29, %v760_v51  ;;  %v2616_v9 = vadd.f32 %v652_v34, %v2428_v63  ;;  %v660_v4 = vmul.f32 %v1600_v6, %v2495_v38 }
  0xeb   : >> { %v661_v11 = vmul.f32 %v1602_v35, %v2495_v38  ;;  %v2621_v44 = vadd.f32 %v653_v31, %v2433_v27  ;;  %v662_v2 = vmul.f32 %v1604_v57, %v2495_v38  ;;  %v663_v30 = vmul.f32 %v1606_v28, %v2495_v38  ;;  %v3625_v38 = vld [vmem:[#allocation102_spill] sm:$0xff]  ;;  %v3631_v35 = vld [vmem:[#allocation96_spill] sm:$0xff] }
  0xec   : >> { %v701_v45 = vmul.f32 %v1608_v53, %v2505_v62  ;;  %v3623_v16 = vmax.f32 %v2502_v40, 1e-09  ;;  %v767_v51 = vadd.f32 %v765_v29, %v761_v12  ;;  %v768_v63 = vadd.f32 %v765_v29, %v762_v5  ;;  %v3628_v5 = vld [vmem:[#allocation94_spill] sm:$0xff] }
  0xed   : >> { %v769_v1 = vadd.f32 %v765_v29, %v763_v8  ;;  %v2629_v0 = vadd.f32 %v654_v7, %v2481_v49  ;;  %v710_v54 = vmul.f32 %v1608_v53, %v2508_v22  ;;  %v719_v27 = vmul.f32 %v1608_v53, %v2511_v59  ;;  %v3630_v49 = vld [vmem:[#allocation95_spill] sm:$0xff] }
  0xee   : >> { %1613 = vrcp.f32 %v3623_v16  ;;  %v770_v6 = vadd.f32 %v766_v43, %v2524_v14  ;;  %v664_v28 = vadd.f32 %v660_v4, %v2443_v25  ;;  %v728_v52 = vmul.f32 %v1608_v53, %v3625_v38  ;;  %v3633_v14 = vld [vmem:[#allocation101_spill] sm:$0xff] }
  0xef   : >> { %v737_v40 = vmul.f32 %v1608_v53, %v3626_v23  ;;  %v746_v12 = vmul.f32 %v1608_v53, %v3627_v26  ;;  %v2639_v8 = vadd.f32 %v661_v11, %v3628_v5  ;;  %v2642_v29 = vadd.f32 %v662_v2, %v3630_v49  ;;  %v1610_v11 = vpop.eup %1609  ;;  %v3643_v5 = vld [vmem:[#allocation93_spill] sm:$0xff] }
  0xf0   : >> { %v2645_v57 = vadd.f32 %v663_v30, %v3631_v35  ;;  %v2648_v25 = vadd.f32 %v1608_v53, %v3633_v14  ;;  %v2650_v48 = vadd.f32 %v701_v45, %v619_v42  ;;  %v771_v47 = vadd.f32 %v767_v51, %v3636_v17  ;;  %v3640_v51 = vld [vmem:[#allocation90_spill] sm:$0xff]  ;;  %v3645_v35 = vld [vmem:[#allocation30_spill] sm:$0xff]  ;;  %v3646_v17 = vld [vmem:[#allocation107_spill] sm:$0xff] }
  0xf1   : >> { %v2654_v56 = vadd.f32 %v768_v63, %v3638_v36  ;;  %v2657_v37 = vadd.f32 %v769_v1, %v3639_v60  ;;  %v2659_v55 = vadd.f32 %v710_v54, %v628_v21  ;;  %v2661_v34 = vadd.f32 %v719_v27, %v637_v15  ;;  %v1612_v15 = vpop.eup %1611  ;;  %v3641_v27 = vld [vmem:[#allocation91_spill] sm:$0xff] }
  0xf2   : >> { %v774_v31 = vmax.f32 %v770_v6, 1e-09  ;;  %v840_v7 = vstv %s3624_s0  ;;  %v2664_v53 = vadd.f32 %v728_v52, %v646_v58  ;;  %v2666_v43 = vadd.f32 %v737_v40, %v655_v10  ;;  %v3642_v40 = vld [vmem:[#allocation92_spill] sm:$0xff]  ;;  %s3676_s0 = sld [smem:[#allocation85_spill]] }
  0xf3   : >> { %v2668_v42 = vadd.f32 %v746_v12, %v664_v28  ;;  %v2671_v4 = vstv %s3629_s8  ;;  %v2674_v2 = vstv %s3632_s9  ;;  %v2677_v30 = vstv %s3634_s30  ;;  %s3677_s8 = sld [smem:[#allocation86_spill]]  ;;  %s3678_s9 = sld [smem:[#allocation87_spill]] }
  0xf4   : >> { %v2680_v45 = vstv %s3635_s25  ;;  %v2683_v21 = vstv %s3637_s13  ;;  %v775_v16 = vmax.f32 %v771_v47, 1e-09  ;;  %v776_v58 = vmax.f32 %v2654_v56, 1e-09  ;;  %s3689_s30 = sshll.u32 %s1817_s12, 3  ;;  %s305_s12 = sadd.s32 1, %s1817_s12  }
  0xf5   : >> { %v777_v10 = vmax.f32 %v2657_v37, 1e-09  ;;  %v2688_v63 = vadd.f32 %v840_v7, %v3640_v51  ;;  %v702_v1 = vmul.f32 %v1610_v11, %v2505_v62  ;;  %v703_v54 = vmul.f32 %v1612_v15, %v2505_v62  ;;  %v3648_v37 = vld [vmem:[#allocation106_spill] sm:$0xff]  ;;  %s3238_s25 = sshra.s32 %s3689_s30, 3  ;;  %p302_p4 = scmp.ge.s32.totalorder %s305_s12, 32  }
  0xf6   : >> { %1615 = vrcp.f32 %v774_v31  ;;  %v2693_v6 = vadd.f32 %v840_v7, %v3641_v27  ;;  %v711_v52 = vmul.f32 %v1610_v11, %v2508_v22  ;;  %v2697_v12 = vadd.f32 %v840_v7, %v3642_v40  ;;  %s1478_s13 = sshll.u32 %s3238_s25, 5  ;;  %s1212_s12 = scalar_lea.sflag (%p302_p4), [#allocation3], %s1948_s29 }
  0xf7   : >> { %v2700_v49 = vadd.f32 %v840_v7, %v3643_v5  ;;  %v846_v14 = vmul.f32 %v2683_v21, %v3645_v35  ;;  %v2705_v47 = vadd.f32 %v1610_v11, %v3646_v17  ;;  %v712_v56 = vmul.f32 %v1612_v15, %v2508_v22 }
  0xf8   : >> { %v1614_v28 = vpop.eup %1613  ;;  %v2711_v31 = vadd.f32 %v1612_v15, %v3648_v37  ;;  %v720_v40 = vmul.f32 %v1610_v11, %v2511_v59  ;;  %v721_v7 = vmul.f32 %v1612_v15, %v2511_v59  ;;  %v2720_v17 = vadd.f32 %v702_v1, %v2572_v46 }
  0xf9   : >> { %3644 = vst [vmem:[#allocation102_spill] sm:$0xff] %v2700_v49  ;;  %3647 = vst [vmem:[#allocation103_spill] sm:$0xff] %v2705_v47  ;;  %v704_v36 = vmul.f32 %v1614_v28, %v2505_v62  ;;  %v713_v60 = vmul.f32 %v1614_v28, %v2508_v22  ;;  %v722_v5 = vmul.f32 %v1614_v28, %v2511_v59  ;;  %1617 = vrcp.f32 %v775_v16 }
  0xfa   : >> { %3649 = vst [vmem:[#allocation104_spill] sm:$0xff] %v2711_v31  ;;  %v2717_v49 = vadd.f32 %v1614_v28, %v2566_v18  ;;  %v2723_v62 = vadd.f32 %v703_v54, %v2575_v33  ;;  %v729_v22 = vmul.f32 %v1610_v11, %v3625_v38  ;;  %v2727_v37 = vadd.f32 %v711_v52, %v2579_v61 }
  0xfb   : >> { %v730_v31 = vmul.f32 %v1612_v15, %v3625_v38  ;;  %v731_v47 = vmul.f32 %v1614_v28, %v3625_v38  ;;  %v738_v59 = vmul.f32 %v1610_v11, %v3626_v23  ;;  %v2733_v18 = vadd.f32 %v704_v36, %v2586_v32 }
  0xfc   : >> { %v2736_v46 = vadd.f32 %v712_v56, %v2582_v13  ;;  %v2739_v33 = vadd.f32 %v713_v60, %v2589_v3  ;;  %v739_v1 = vmul.f32 %v1612_v15, %v3626_v23  ;;  %v2743_v61 = vadd.f32 %v720_v40, %v2594_v20  ;;  %v3653_v56 = vld [vmem:[#allocation100_spill] sm:$0xff] }
  0xfd   : >> { %v2746_v54 = vadd.f32 %v721_v7, %v2597_v41  ;;  %v2749_v38 = vadd.f32 %v722_v5, %v2600_v19  ;;  %v850_v52 = vstv %s3650_s1  ;;  %v2753_v32 = vadd.f32 %v729_v22, %v2605_v24  ;;  %v3652_v5 = vld [vmem:[#allocation99_spill] sm:$0xff]  ;;  %s1188_s1 = scalar_lea.vmem %s2115_s21, %s1478_s13 [#allocation7] }
  0xfe   : >> { %v740_v13 = vmul.f32 %v1614_v28, %v3626_v23  ;;  %v747_v3 = vmul.f32 %v1610_v11, %v3627_v26  ;;  %v2758_v36 = vadd.f32 %v730_v31, %v2608_v39  ;;  %v2761_v20 = vadd.f32 %v731_v47, %v2611_v50  ;;  %v3651_v11 = vld [vmem:[#allocation89_spill] sm:$0xff]  ;;  %v3655_v31 = vld [vmem:[#allocation34_spill] sm:$0xff]  ;;  %v3656_v22 = vld [vmem:[#allocation37_spill] sm:$0xff] }
  0xff   : >> { %v2764_v41 = vadd.f32 %v738_v59, %v2616_v9  ;;  %v748_v19 = vmul.f32 %v1612_v15, %v3627_v26  ;;  %v2768_v24 = vadd.f32 %v739_v1, %v2621_v44  ;;  %v749_v23 = vmul.f32 %v1614_v28, %v3627_v26  ;;  %v3654_v47 = vld [vmem:[#allocation33_spill] sm:$0xff] }
 0x100   : >> { %v1616_v40 = vpop.eup %1615  ;;  %1619 = vrcp.f32 %v776_v58  ;;  %v851_v16 = vmul.f32 %v850_v52, %v3651_v11  ;;  %v847_v9 = vmul.f32 %v2683_v21, %v3654_v47  ;;  %v848_v26 = vmul.f32 %v2683_v21, %v3655_v31 }
 0x101   : >> { %v787_v39 = vmul.f32 %v1616_v40, %v3652_v5  ;;  %v796_v60 = vmul.f32 %v1616_v40, %v3653_v56  ;;  %v805_v50 = vmul.f32 %v1616_v40, %v2671_v4  ;;  %1621 = vrcp.f32 %v777_v10 }
 0x102   : >> { %v814_v15 = vmul.f32 %v1616_v40, %v2674_v2  ;;  %v823_v44 = vmul.f32 %v1616_v40, %v2677_v30  ;;  %v2782_v58 = vadd.f32 %v740_v13, %v2629_v0  ;;  %v2785_v28 = vadd.f32 %v747_v3, %v2639_v8 }
 0x103   : >> { %v832_v7 = vmul.f32 %v1616_v40, %v2680_v45  ;;  %v849_v10 = vmul.f32 %v2683_v21, %v3656_v22  ;;  %v2791_v59 = vadd.f32 %v748_v19, %v2642_v29  ;;  %v2794_v1 = vadd.f32 %v749_v23, %v2645_v57 }
 0x104   : >> { %v2797_v52 = vadd.f32 %v1616_v40, %v2648_v25  ;;  %v852_v0 = vadd.f32 %v851_v16, %v846_v14  ;;  %v2800_v8 = vadd.f32 %v787_v39, %v2650_v48  ;;  %v2803_v13 = vadd.f32 %v796_v60, %v2659_v55 }
 0x105   : >> { %v2806_v21 = vadd.f32 %v805_v50, %v2661_v34  ;;  %v853_v29 = vadd.f32 %v851_v16, %v847_v9  ;;  %v2809_v57 = vadd.f32 %v814_v15, %v2664_v53  ;;  %v2812_v25 = vadd.f32 %v823_v44, %v2666_v43  ;;  %v1618_v34 = vpop.eup %1617  ;;  %v3671_v44 = vld [vmem:[#allocation92_spill] sm:$0xff] }
 0x106   : >> { %3660 = vst [vmem:[#allocation94_spill] sm:$0xff] %v2800_v8  ;;  %3662 = vst [vmem:[#allocation95_spill] sm:$0xff] %v2803_v13  ;;  %v854_v14 = vadd.f32 %v851_v16, %v848_v26  ;;  %v926_v3 = vstv %s2110_s22  ;;  %v2816_v48 = vadd.f32 %v832_v7, %v2668_v42  ;;  %v855_v19 = vadd.f32 %v851_v16, %v849_v10  ;;  %v3672_v10 = vld [vmem:[#allocation103_spill] sm:$0xff] }
 0x107   : >> { %3663 = vst [vmem:[#allocation96_spill] sm:$0xff] %v2806_v21  ;;  %3666 = vst [vmem:[#allocation101_spill] sm:$0xff] %v2809_v57  ;;  %v2819_v55 = vstv %s3657_s2  ;;  %v931_v40 = vstv %s2106_s14  ;;  %v856_v23 = vadd.f32 %v852_v0, %v2688_v63  ;;  %v2824_v39 = vstv %s3658_s3  ;;  %s1206_s2 = scalar_lea.vmem %s2119_s24, %s1478_s13 [#allocation8]  ;;  %s3692_s3 = sld [smem:[#allocation20_spill]] (%p302_p4) }
 0x108   : >> { %3667 = vst [vmem:[#allocation97_spill] sm:$0xff] %v2812_v25  ;;  %3668 = vst [vmem:[#allocation105_spill] sm:$0xff] %v2816_v48  ;;  %v2827_v53 = vstv %s3659_s4  ;;  %v2830_v60 = vstv %s3661_s5  ;;  %v857_v43 = vadd.f32 %v853_v29, %v2693_v6  ;;  %v2834_v50 = vstv %s3664_s6  ;;  %v3673_v48 = vld [vmem:[#allocation102_spill] sm:$0xff]  ;;  %v3674_v29 = vld [vmem:[#allocation93_spill] sm:$0xff]  ;;  %s1481_s4 = sshll.u32 (%p302_p4), %s1805_s15, 14  ;;  %s1821_s14 = smov (%p302_p4), [#allocation7]  }
 0x109   : >> { %3669 = vst [vmem:[#allocation98_spill] sm:$0xff] %v2834_v50  ;;  %v2837_v42 = vstv %s3665_s7  ;;  %v927_v16 = vadd.f32 %v926_v3, %v3640_v51  ;;  %v858_v15 = vadd.f32 %v854_v14, %v2697_v12  ;;  %v928_v63 = vadd.f32 %v926_v3, %v3641_v27  ;;  %s3693_s7 = sld [smem:[#allocation110_spill]] (%p302_p4) }
 0x10a   : >> { %3670 = vst [vmem:[#allocation90_spill] sm:$0xff] %v2837_v42  ;;  %v1620_v9 = vpop.eup %1619  ;;  %v929_v26 = vadd.f32 %v926_v3, %v3671_v44  ;;  %v932_v7 = vmul.f32 %v931_v40, %v3645_v35  ;;  %v2845_v0 = vadd.f32 %v1618_v34, %v3672_v10  ;;  %v859_v6 = vadd.f32 %v855_v19, %v3673_v48  ;;  %v3675_v44 = vld [vmem:[#allocation104_spill] sm:$0xff] }
 0x10b   : >> { %v2849_v25 = vadd.f32 %v926_v3, %v3674_v29  ;;  %v936_v42 = vstv %s2108_s26  ;;  %v1622_v50 = vpop.eup %1621  ;;  %v788_v51 = vmul.f32 %v1618_v34, %v3652_v5  ;;  %v789_v12 = vmul.f32 %v1620_v9, %v3652_v5 }
 0x10c   : >> { %v860_v14 = vmax.f32 %v856_v23, 1e-09  ;;  %v937_v27 = vmul.f32 %v936_v42, %v3651_v11  ;;  %v2856_v57 = vadd.f32 %v1620_v9, %v3675_v44  ;;  %v797_v10 = vmul.f32 %v1618_v34, %v3653_v56 }
 0x10d   : >> { %v806_v35 = vmul.f32 %v1618_v34, %v2671_v4  ;;  %v861_v48 = vmax.f32 %v857_v43, 1e-09  ;;  %v798_v3 = vmul.f32 %v1620_v9, %v3653_v56  ;;  %v807_v19 = vmul.f32 %v1620_v9, %v2671_v4  ;;  %p3694_p10 = scmp.ne.s32.totalorder (%p302_p4), %s3692_s3, 0 }
 0x10e   : >> { %v862_v29 = vmax.f32 %v858_v15, 1e-09  ;;  %v938_v21 = vadd.f32 %v937_v27, %v932_v7  ;;  %v2863_v13 = vadd.f32 %v1622_v50, %v2717_v49  ;;  %v790_v23 = vmul.f32 %v1622_v50, %v3652_v5 }
 0x10f   : >> { %v799_v42 = vmul.f32 %v1622_v50, %v3653_v56  ;;  %v863_v44 = vmax.f32 %v859_v6, 1e-09  ;;  %v2868_v11 = vadd.f32 %v788_v51, %v2720_v17  ;;  %v2871_v8 = vadd.f32 %v789_v12, %v2723_v62 }
 0x110   : >> { %1623 = vrcp.f32 %v860_v14  ;;  %v933_v43 = vmul.f32 %v931_v40, %v3654_v47  ;;  %v2875_v15 = vadd.f32 %v797_v10, %v2727_v37  ;;  %v934_v49 = vmul.f32 %v931_v40, %v3655_v31 }
 0x111   : >> { %1625 = vrcp.f32 %v861_v48  ;;  %v942_v7 = vadd.f32 %v938_v21, %v927_v16  ;;  %v2879_v5 = vadd.f32 %v798_v3, %v2736_v46  ;;  %v808_v56 = vmul.f32 %v1622_v50, %v2671_v4 }
 0x112   : >> { %1627 = vrcp.f32 %v862_v29  ;;  %v935_v17 = vmul.f32 %v931_v40, %v3656_v22  ;;  %v2884_v62 = vadd.f32 %v790_v23, %v2733_v18  ;;  %v2887_v6 = vadd.f32 %v799_v42, %v2739_v33 }
 0x113   : >> { %v815_v37 = vmul.f32 %v1618_v34, %v2674_v2  ;;  %1629 = vrcp.f32 %v863_v44  ;;  %v816_v51 = vmul.f32 %v1620_v9, %v2674_v2  ;;  %v817_v21 = vmul.f32 %v1622_v50, %v2674_v2 }
 0x114   : >> { %v824_v46 = vmul.f32 %v1618_v34, %v2677_v30  ;;  %v939_v16 = vadd.f32 %v937_v27, %v933_v43  ;;  %v825_v4 = vmul.f32 %v1620_v9, %v2677_v30  ;;  %v826_v40 = vmul.f32 %v1622_v50, %v2677_v30 }
 0x115   : >> { %v940_v12 = vadd.f32 %v937_v27, %v934_v49  ;;  %v946_v18 = vmax.f32 %v942_v7, 1e-09  ;;  %v833_v14 = vmul.f32 %v1618_v34, %v2680_v45  ;;  %v834_v33 = vmul.f32 %v1620_v9, %v2680_v45 }
 0x116   : >> { %v835_v10 = vmul.f32 %v1622_v50, %v2680_v45  ;;  %v941_v48 = vadd.f32 %v937_v27, %v935_v17  ;;  %v2899_v3 = vadd.f32 %v806_v35, %v2743_v61  ;;  %v2902_v2 = vadd.f32 %v807_v19, %v2746_v54 }
 0x117   : >> { %v2905_v29 = vadd.f32 %v808_v56, %v2749_v38  ;;  %v2908_v30 = vadd.f32 %v815_v37, %v2753_v32  ;;  %v2911_v34 = vadd.f32 %v816_v51, %v2758_v36  ;;  %v2914_v45 = vadd.f32 %v817_v21, %v2761_v20 }
 0x118   : >> { %v2917_v35 = vadd.f32 %v824_v46, %v2764_v41  ;;  %v943_v61 = vadd.f32 %v939_v16, %v928_v63  ;;  %v2920_v54 = vadd.f32 %v825_v4, %v2768_v24  ;;  %v2923_v38 = vadd.f32 %v826_v40, %v2782_v58 }
 0x119   : >> { %v944_v32 = vadd.f32 %v940_v12, %v929_v26  ;;  %1631 = vrcp.f32 %v946_v18  ;;  %v2926_v50 = vadd.f32 %v833_v14, %v2785_v28  ;;  %v2929_v20 = vadd.f32 %v834_v33, %v2791_v59  ;;  %v3679_v12 = vld [vmem:[#allocation94_spill] sm:$0xff] }
 0x11a   : >> { %v1624_v36 = vpop.eup %1623  ;;  %v2932_v41 = vadd.f32 %v835_v10, %v2794_v1  ;;  %v945_v24 = vadd.f32 %v941_v48, %v2849_v25  ;;  %v2938_v58 = vstv %s3676_s0  ;;  %v2941_v63 = vstv %s3677_s8  ;;  %v3680_v10 = vld [vmem:[#allocation95_spill] sm:$0xff]  ;;  %s3272_s0 = scalar_lea.hbm (%p302_p4), %s3693_s7, %s1481_s4  ;;  %s1233_s8 = sshll.u32 (%p302_p4), %s2115_s21, 4  ;;  %s3275_s8 = int_to_ptr.vmem [resolvable:$true] %s1233_s8 }
 0x11b   : >> { %v2935_v9 = vpop.eup %1625  ;;  %v2944_v26 = vstv %s3678_s9  ;;  %v2947_v27 = vstv %s2100_s16  ;;  %v873_v19 = vmul.f32 %v1624_v36, %v2819_v55  ;;  %v947_v59 = vmax.f32 %v943_v61, 1e-09  ;;  %s1691_s9 = scalar_lea.vmem (%p302_p4), %s3275_s8, 16384  ;;  %s1695_s16 = sshll.u32 (%p302_p4), %s1821_s14, 4  ;;  %s1696_s16 = int_to_ptr.vmem [resolvable:$false] %s1695_s16 }
 0x11c   : >> { %v1628_v28 = vpop.eup %1627  ;;  %v2951_v23 = vstv %s2102_s28  ;;  %v2954_v1 = vstv %s2104_s23  ;;  %v874_v25 = vmul.f32 %v2935_v9, %v2819_v55  ;;  %v882_v43 = vmul.f32 %v1624_v36, %v2824_v39  ;;  %p1692_p8 = scmp.ne.s32.totalorder (%p302_p4), %s3275_s8, %s1691_s9  ;;  %s1697_s17 = scalar_lea.vmem (%p302_p4), %s1696_s16, 32768 }
 0x11d   : >> { %v1630_v42 = vpop.eup %1629  ;;  %v875_v44 = vmul.f32 %v1628_v28, %v2819_v55  ;;  %v948_v49 = vmax.f32 %v944_v32, 1e-09  ;;  %v868_v7 = vadd.f32 %v1624_v36, %v2797_v52  ;;  %v883_v56 = vmul.f32 %v2935_v9, %v2824_v39  ;;  %p1698_p1 = scmp.lt.s32.totalorder (%p302_p4), %s3275_s8, %s1696_s16  ;;  %p1699_p3 = scmp.lt.s32.totalorder (%p302_p4), %s1697_s17, %s1691_s9 }
 0x11e   : >> { %v891_v17 = vmul.f32 %v1624_v36, %v2827_v53  ;;  %v949_v37 = vmax.f32 %v945_v24, 1e-09  ;;  %v2966_v51 = vadd.f32 %v2935_v9, %v2845_v0  ;;  %v884_v21 = vmul.f32 %v1628_v28, %v2824_v39  ;;  %p1693_p11 = pnand (%p302_p4), %p1692_p8, %p3694_p10 }
 0x11f   : >> { %v892_v46 = vmul.f32 %v2935_v9, %v2827_v53  ;;  %v900_v16 = vmul.f32 %v1624_v36, %v2830_v60  ;;  %v2973_v4 = vadd.f32 %v1628_v28, %v2856_v57  ;;  %v2976_v52 = vadd.f32 %v1630_v42, %v2863_v13  ;;  %p1700_p5 = por (%p302_p4), %p1699_p3, %p1698_p1 }
 0x120   : >> { %v876_v40 = vmul.f32 %v1630_v42, %v2819_v55  ;;  %v877_v18 = vadd.f32 %v873_v19, %v3679_v12  ;;  %v2981_v0 = vadd.f32 %v874_v25, %v2868_v11  ;;  %v2984_v14 = vadd.f32 %v875_v44, %v2871_v8  ;;  %v3681_v11 = vld [vmem:[#allocation96_spill] sm:$0xff]  ;;  %v3682_v8 = vld [vmem:[#allocation101_spill] sm:$0xff]  ;;  %p1694_p13 = pneg (%p302_p4), %p1693_p11 }
 0x121   : >> { %v885_v33 = vmul.f32 %v1630_v42, %v2824_v39  ;;  %v886_v48 = vadd.f32 %v882_v43, %v3680_v10  ;;  %v2989_v57 = vadd.f32 %v883_v56, %v2875_v15  ;;  %v893_v13 = vmul.f32 %v1628_v28, %v2827_v53 }
 0x122   : >> { %v894_v61 = vmul.f32 %v1630_v42, %v2827_v53  ;;  %1633 = vrcp.f32 %v947_v59  ;;  %v2994_v32 = vadd.f32 %v884_v21, %v2879_v5  ;;  %v895_v24 = vadd.f32 %v891_v17, %v3681_v11  ;;  %v3683_v17 = vld [vmem:[#allocation98_spill] sm:$0xff]  ;;  %p1701_p6 = pnand (%p302_p4), %p1700_p5, %p1694_p13 }
 0x123   : >> { %v1632_v55 = vpop.eup %1631  ;;  %v904_v19 = vadd.f32 %v900_v16, %v3682_v8  ;;  %1635 = vrcp.f32 %v948_v49  ;;  %v3003_v53 = vadd.f32 %v876_v40, %v2884_v62  ;;  %v3006_v59 = vadd.f32 %v885_v33, %v2887_v6  ;;  %v3684_v16 = vld [vmem:[#allocation90_spill] sm:$0xff] }
 0x124   : >> { %v959_v39 = vmul.f32 %v1632_v55, %v2938_v58  ;;  %v968_v25 = vmul.f32 %v1632_v55, %v2941_v63  ;;  %v977_v15 = vmul.f32 %v1632_v55, %v2944_v26  ;;  %v986_v44 = vmul.f32 %v1632_v55, %v2947_v27 }
 0x125   : >> { %v3009_v5 = vadd.f32 %v892_v46, %v2899_v3  ;;  %1637 = vrcp.f32 %v949_v37  ;;  %v3012_v43 = vadd.f32 %v893_v13, %v2902_v2  ;;  %v3015_v49 = vadd.f32 %v894_v61, %v2905_v29 }
 0x126   : >> { %v901_v56 = vmul.f32 %v2935_v9, %v2830_v60  ;;  %v909_v21 = vmul.f32 %v1624_v36, %v3683_v17  ;;  %v902_v62 = vmul.f32 %v1628_v28, %v2830_v60  ;;  %v903_v6 = vmul.f32 %v1630_v42, %v2830_v60 }
 0x127   : >> { %v918_v40 = vmul.f32 %v1624_v36, %v3684_v16  ;;  %v954_v3 = vadd.f32 %v1632_v55, %v868_v7  ;;  %v3023_v46 = vadd.f32 %v959_v39, %v877_v18  ;;  %v3025_v37 = vadd.f32 %v968_v25, %v886_v48  ;;  %v3685_v36 = vld [vmem:[#allocation97_spill] sm:$0xff] }
 0x128   : >> { %v3027_v2 = vadd.f32 %v977_v15, %v895_v24  ;;  %v3029_v29 = vadd.f32 %v986_v44, %v904_v19  ;;  %v910_v12 = vmul.f32 %v2935_v9, %v3683_v17  ;;  %v911_v33 = vmul.f32 %v1628_v28, %v3683_v17  ;;  %v3686_v24 = vld [vmem:[#allocation105_spill] sm:$0xff] }
 0x129   : >> { %v912_v10 = vmul.f32 %v1630_v42, %v3683_v17  ;;  %v919_v60 = vmul.f32 %v2935_v9, %v3684_v16  ;;  %v913_v7 = vadd.f32 %v909_v21, %v3685_v36  ;;  %v920_v18 = vmul.f32 %v1628_v28, %v3684_v16 }
 0x12a   : >> { %v921_v48 = vmul.f32 %v1630_v42, %v3684_v16  ;;  %v995_v13 = vmul.f32 %v1632_v55, %v2951_v23  ;;  %v905_v61 = vadd.f32 %v901_v56, %v2908_v30  ;;  %v906_v11 = vadd.f32 %v902_v62, %v2911_v34 }
 0x12b   : >> { %v922_v8 = vadd.f32 %v918_v40, %v3686_v24  ;;  %v1004_v19 = vmul.f32 %v1632_v55, %v2954_v1  ;;  %v907_v25 = vadd.f32 %v903_v6, %v2914_v45  ;;  %1639 = vrcp.f32 %v954_v3 }
 0x12c   : >> { %v1634_v39 = vpop.eup %1633  ;;  %v1044_v9 = vmul.f32 %v3027_v2, %v3023_v46  ;;  %v1048_v28 = vmul.f32 %v3029_v29, %v3025_v37  ;;  %v914_v15 = vadd.f32 %v910_v12, %v2917_v35  ;;  %v915_v30 = vadd.f32 %v911_v33, %v2920_v54 }
 0x12d   : >> { %v1636_v42 = vpop.eup %1635  ;;  %v916_v34 = vadd.f32 %v912_v10, %v2923_v38  ;;  %v923_v44 = vadd.f32 %v919_v60, %v2926_v50  ;;  %v924_v55 = vadd.f32 %v920_v18, %v2929_v20  ;;  %v3056_v45 = vadd.f32 %v921_v48, %v2932_v41 }
 0x12e   : >> { %v960_v56 = vmul.f32 %v1634_v39, %v2938_v58  ;;  %v3059_v17 = vadd.f32 %v995_v13, %v913_v7  ;;  %v961_v62 = vmul.f32 %v1636_v42, %v2938_v58  ;;  %v3062_v6 = vadd.f32 %v1004_v19, %v922_v8 }
 0x12f   : >> { %v1638_v21 = vpop.eup %1637  ;;  %v3066_v35 = vmul.f32 %v3027_v2, %v3025_v37  ;;  %v1068_v54 = vmul.f32 %v3029_v29, %v3023_v46  ;;  %v969_v50 = vmul.f32 %v1634_v39, %v2941_v63  ;;  %v970_v20 = vmul.f32 %v1636_v42, %v2941_v63 }
 0x130   : >> { %v962_v38 = vmul.f32 %v1638_v21, %v2938_v58  ;;  %v1052_v41 = vadd.f32 %v1048_v28, %v1044_v9  ;;  %v955_v16 = vadd.f32 %v1634_v39, %v2966_v51  ;;  %v956_v40 = vadd.f32 %v1636_v42, %v2973_v4 }
 0x131   : >> { %v971_v3 = vmul.f32 %v1638_v21, %v2941_v63  ;;  %v978_v12 = vmul.f32 %v1634_v39, %v2944_v26  ;;  %v957_v33 = vadd.f32 %v1638_v21, %v2976_v52  ;;  %v964_v10 = vadd.f32 %v960_v56, %v2981_v0 }
 0x132   : >> { %v979_v60 = vmul.f32 %v1636_v42, %v2944_v26  ;;  %v980_v58 = vmul.f32 %v1638_v21, %v2944_v26  ;;  %v965_v36 = vadd.f32 %v961_v62, %v2984_v14  ;;  %v987_v7 = vmul.f32 %v1634_v39, %v2947_v27 }
 0x133   : >> { %v988_v51 = vmul.f32 %v1636_v42, %v2947_v27  ;;  %v989_v4 = vmul.f32 %v1638_v21, %v2947_v27  ;;  %v966_v63 = vadd.f32 %v962_v38, %v3003_v53  ;;  %v973_v18 = vadd.f32 %v969_v50, %v2989_v57  ;;  %v3687_v50 = vld [vmem:[#allocation30_spill] sm:$0xff] }
 0x134   : >> { %v974_v52 = vadd.f32 %v970_v20, %v2994_v32  ;;  %v996_v0 = vmul.f32 %v1634_v39, %v2951_v23  ;;  %v975_v48 = vadd.f32 %v971_v3, %v3006_v59  ;;  %v997_v26 = vmul.f32 %v1636_v42, %v2951_v23 }
 0x135   : >> { %v998_v14 = vmul.f32 %v1638_v21, %v2951_v23  ;;  %1641 = vrcp.f32 %v955_v16  ;;  %v3092_v13 = vpop.eup %1639  ;;  %v3095_v24 = vadd.f32 %v978_v12, %v3009_v5  ;;  %v3098_v27 = vadd.f32 %v979_v60, %v3012_v43  ;;  %v3688_v16 = vld [vmem:[#allocation89_spill] sm:$0xff] }
 0x136   : >> { %v3101_v57 = vadd.f32 %v980_v58, %v3015_v49  ;;  %1643 = vrcp.f32 %v956_v40  ;;  %v3103_v32 = vadd.f32 %v987_v7, %v905_v61  ;;  %v3105_v53 = vadd.f32 %v988_v51, %v906_v11 }
 0x137   : >> { %v3107_v59 = vadd.f32 %v989_v4, %v907_v25  ;;  %1645 = vrcp.f32 %v957_v33  ;;  %v1000_v23 = vadd.f32 %v996_v0, %v914_v15  ;;  %v1005_v8 = vmul.f32 %v1634_v39, %v2954_v1 }
 0x138   : >> { %v1006_v5 = vmul.f32 %v1636_v42, %v2954_v1  ;;  %v1072_v19 = vsub.f32 %v3066_v35, %v1068_v54  ;;  %v1001_v43 = vadd.f32 %v997_v26, %v915_v30  ;;  %v1002_v9 = vadd.f32 %v998_v14, %v916_v34 }
 0x139   : >> { %v1007_v49 = vmul.f32 %v1638_v21, %v2954_v1  ;;  %v1020_v61 = vmul.f32 %v3092_v13, %v3023_v46  ;;  %v1024_v11 = vmul.f32 %v3092_v13, %v3025_v37  ;;  %v1045_v25 = vmul.f32 %v3095_v24, %v964_v10 }
 0x13a   : >> { %v1046_v28 = vmul.f32 %v3098_v27, %v965_v36  ;;  %v1056_v39 = vmul.f32 %v3092_v13, %v1052_v41  ;;  %v1047_v42 = vmul.f32 %v3101_v57, %v966_v63  ;;  %v1049_v15 = vmul.f32 %v3103_v32, %v973_v18 }
 0x13b   : >> { %v1050_v30 = vmul.f32 %v3105_v53, %v974_v52  ;;  %v1051_v1 = vmul.f32 %v3107_v59, %v975_v48  ;;  %v1009_v34 = vadd.f32 %v1005_v8, %v923_v44  ;;  %v1010_v56 = vadd.f32 %v1006_v5, %v924_v55 }
 0x13c   : >> { %v1065_v46 = vmul.f32 %v3095_v24, %v973_v18  ;;  %v1069_v37 = vmul.f32 %v3103_v32, %v964_v10  ;;  %v1066_v21 = vmul.f32 %v3098_v27, %v974_v52  ;;  %v1067_v62 = vmul.f32 %v3101_v57, %v975_v48 }
 0x13d   : >> { %v1070_v35 = vmul.f32 %v3105_v53, %v965_v36  ;;  %v1071_v54 = vmul.f32 %v3107_v59, %v966_v63  ;;  %v1011_v38 = vadd.f32 %v1007_v49, %v3056_v45  ;;  %v1036_v20 = vsub.f32 %v3687_v50, %v1020_v61 }
 0x13e   : >> { %v1060_v41 = vsub.f32 %v3059_v17, %v1056_v39  ;;  %v1076_v44 = vmul.f32 %v3092_v13, %v1072_v19  ;;  %v1040_v40 = vsub.f32 %v3688_v16, %v1024_v11  ;;  %v1053_v3 = vadd.f32 %v1049_v15, %v1045_v25 }
 0x13f   : >> { %v3134_v55 = vpop.eup %1641  ;;  %v1054_v12 = vadd.f32 %v1050_v30, %v1046_v28  ;;  %v1055_v33 = vadd.f32 %v1051_v1, %v1047_v42  ;;  %v1073_v45 = vsub.f32 %v1065_v46, %v1069_v37  ;;  %v1108_v51 = vmul.f32 %v1036_v20, %v1036_v20 }
 0x140   : >> { %v3137_v60 = vpop.eup %1643  ;;  %v1021_v58 = vmul.f32 %v3134_v55, %v964_v10  ;;  %v1025_v7 = vmul.f32 %v3134_v55, %v973_v18  ;;  %v1074_v26 = vsub.f32 %v1066_v21, %v1070_v35  ;;  %v1075_v14 = vsub.f32 %v1067_v62, %v1071_v54 }
 0x141   : >> { %v3141_v4 = vpop.eup %1645  ;;  %v1022_v17 = vmul.f32 %v3137_v60, %v965_v36  ;;  %v1026_v0 = vmul.f32 %v3137_v60, %v974_v52  ;;  %v1080_v19 = vsub.f32 %v3062_v6, %v1076_v44  ;;  %v1084_v49 = vmul.f32 %v1060_v41, %v1036_v20 }
 0x142   : >> { %v1023_v8 = vmul.f32 %v3141_v4, %v966_v63  ;;  %v1027_v5 = vmul.f32 %v3141_v4, %v975_v48  ;;  %v1037_v10 = vsub.f32 %v3654_v47, %v1021_v58  ;;  %v1041_v61 = vsub.f32 %v3688_v16, %v1025_v7 }
 0x143   : >> { %v1038_v18 = vsub.f32 %v3655_v31, %v1022_v17  ;;  %v1112_v11 = vmul.f32 %v1040_v40, %v1040_v40  ;;  %v1042_v52 = vsub.f32 %v3688_v16, %v1026_v0  ;;  %v1057_v25 = vmul.f32 %v3134_v55, %v1053_v3 }
 0x144   : >> { %v1039_v36 = vsub.f32 %v3656_v22, %v1023_v8  ;;  %v1058_v63 = vmul.f32 %v3137_v60, %v1054_v12  ;;  %v1059_v48 = vmul.f32 %v3141_v4, %v1055_v33  ;;  %v1077_v6 = vmul.f32 %v3134_v55, %v1073_v45 }
 0x145   : >> { %v1078_v28 = vmul.f32 %v3137_v60, %v1074_v26  ;;  %v1079_v47 = vmul.f32 %v3141_v4, %v1075_v14  ;;  %v1043_v31 = vsub.f32 %v3688_v16, %v1027_v5  ;;  %v1061_v39 = vsub.f32 %v1000_v23, %v1057_v25 }
 0x146   : >> { %v1062_v42 = vsub.f32 %v1001_v43, %v1058_v63  ;;  %v1088_v15 = vmul.f32 %v1080_v19, %v1040_v40  ;;  %v1063_v22 = vsub.f32 %v1002_v9, %v1059_v48  ;;  %v1081_v30 = vsub.f32 %v1009_v34, %v1077_v6 }
 0x147   : >> { %v1082_v1 = vsub.f32 %v1010_v56, %v1078_v28  ;;  %v1083_v46 = vsub.f32 %v1011_v38, %v1079_v47  ;;  %v1085_v37 = vmul.f32 %v1061_v39, %v1037_v10  ;;  %v1096_v62 = vmul.f32 %v1060_v41, %v1040_v40 }
 0x148   : >> { %v1089_v21 = vmul.f32 %v1081_v30, %v1041_v61  ;;  %v1100_v35 = vmul.f32 %v1080_v19, %v1036_v20  ;;  %v3160_v54 = vadd.f32 %v1112_v11, %v1108_v51  ;;  %v1086_v50 = vmul.f32 %v1062_v42, %v1038_v18 }
 0x149   : >> { %v1090_v44 = vmul.f32 %v1082_v1, %v1042_v52  ;;  %v3162_v3 = vadd.f32 %v1088_v15, %v1084_v49  ;;  %v1097_v12 = vmul.f32 %v1061_v39, %v1041_v61  ;;  %v1087_v33 = vmul.f32 %v1063_v22, %v1039_v36 }
 0x14a   : >> { %v1091_v16 = vmul.f32 %v1083_v46, %v1043_v31  ;;  %v1098_v23 = vmul.f32 %v1062_v42, %v1042_v52  ;;  %v1099_v43 = vmul.f32 %v1063_v22, %v1043_v31  ;;  %v3164_v58 = vadd.f32 %v1089_v21, %v1085_v37 }
 0x14b   : >> { %v1101_v9 = vmul.f32 %v1081_v30, %v1037_v10  ;;  %v1102_v34 = vmul.f32 %v1082_v1, %v1038_v18  ;;  %v1109_v56 = vmul.f32 %v1037_v10, %v1037_v10  ;;  %v1103_v38 = vmul.f32 %v1083_v46, %v1039_v36 }
 0x14c   : >> { %v1110_v7 = vmul.f32 %v1038_v18, %v1038_v18  ;;  %v1111_v41 = vmul.f32 %v1039_v36, %v1039_v36  ;;  %v1113_v20 = vmul.f32 %v1041_v61, %v1041_v61  ;;  %v3166_v40 = vadd.f32 %v1090_v44, %v1086_v50 }
 0x14d   : >> { %v1114_v45 = vmul.f32 %v1042_v52, %v1042_v52  ;;  %v1115_v51 = vmul.f32 %v1043_v31, %v1043_v31  ;;  %1647 = vrsqrt.f32 %v3160_v54  ;;  %v3169_v17 = vadd.f32 %v1091_v16, %v1087_v33 }
 0x14e   : >> { %v3171_v0 = vsub.f32 %v1096_v62, %v1100_v35  ;;  %v3173_v26 = vadd.f32 %v1113_v20, %v1109_v56  ;;  %v3175_v14 = vsub.f32 %v1097_v12, %v1101_v9  ;;  %v3177_v8 = vsub.f32 %v1098_v23, %v1102_v34 }
 0x14f   : >> { %v3179_v5 = vadd.f32 %v1114_v45, %v1110_v7  ;;  %v3181_v19 = vadd.f32 %v1115_v51, %v1111_v41  ;;  %v3183_v49 = vsub.f32 %v1099_v43, %v1103_v38  ;;  %v1148_v10 = vmul.f32 %v3162_v3, %v3162_v3  ;;  %v3690_v41 = vld [vmem:[#allocation29_spill] sm:$0xff] }
 0x150   : >> { %1649 = vrsqrt.f32 %v3173_v26  ;;  %v1149_v18 = vmul.f32 %v3164_v58, %v3164_v58  ;;  %v1150_v61 = vmul.f32 %v3166_v40, %v3166_v40  ;;  %v1151_v11 = vmul.f32 %v3169_v17, %v3169_v17 }
 0x151   : >> { %1651 = vrsqrt.f32 %v3179_v5  ;;  %v1152_v36 = vmul.f32 %v3171_v0, %v3171_v0  ;;  %v1153_v52 = vmul.f32 %v3175_v14, %v3175_v14  ;;  %v1154_v25 = vmul.f32 %v3177_v8, %v3177_v8 }
 0x152   : >> { %1653 = vrsqrt.f32 %v3181_v19  ;;  %v1155_v63 = vmul.f32 %v3183_v49, %v3183_v49  ;;  %v1028_v37 = vmul.f32 %v3092_v13, %v3027_v2  ;;  %vm1122_vm0 = vcmp.eq.f32.partialorder %v3160_v54, inf }
 0x153   : >> { %v1156_v48 = vadd.f32 %v1152_v36, %v1148_v10  ;;  %v1157_v6 = vadd.f32 %v1153_v52, %v1149_v18  ;;  %v1158_v28 = vadd.f32 %v1154_v25, %v1150_v61  ;;  %v1032_v35 = vmul.f32 %v3092_v13, %v3029_v29 }
 0x154   : >> { %v1159_v47 = vadd.f32 %v1155_v63, %v1151_v11  ;;  %vm1129_vm1 = vcmp.eq.f32.partialorder %v3173_v26, inf  ;;  %v1029_v44 = vmul.f32 %v3134_v55, %v3095_v24  ;;  %v1125_v12 = vand.u32 2147483648, %v3160_v54 }
 0x155   : >> { %v1160_v39 = vadd.f32 1e-20, %v1156_v48  ;;  %v1161_v42 = vadd.f32 1e-20, %v1157_v6  ;;  %v1162_v15 = vadd.f32 1e-20, %v1158_v28  ;;  %v1033_v13 = vmul.f32 %v3134_v55, %v3103_v32 }
 0x156   : >> { %v1163_v22 = vadd.f32 1e-20, %v1159_v47  ;;  %vm1136_vm2 = vcmp.eq.f32.partialorder %v3179_v5, inf  ;;  %vm1124_vm3 = vcmp.eq.f32.partialorder %v3160_v54, 0.0  ;;  %v1132_v29 = vand.u32 2147483648, %v3173_v26 }
 0x157   : >> { %v1648_v31 = vpop.eup %1647  ;;  %1655 = vrsqrt.f32 %v1160_v39  ;;  %vm1143_vm4 = vcmp.eq.f32.partialorder %v3181_v19, inf  ;;  %vm1131_vm5 = vcmp.eq.f32.partialorder %v3173_v26, 0.0  ;;  %v1139_v16 = vand.u32 2147483648, %v3179_v5 }
 0x158   : >> { %v1121_v1 = vmul.f32 %v1648_v31, %v3160_v54  ;;  %1657 = vrsqrt.f32 %v1161_v42  ;;  %v1030_v23 = vmul.f32 %v3137_v60, %v3098_v27  ;;  %vm1138_vm6 = vcmp.eq.f32.partialorder %v3179_v5, 0.0 }
 0x159   : >> { %1659 = vrsqrt.f32 %v1162_v15  ;;  %v1031_v9 = vmul.f32 %v3141_v4, %v3101_v57  ;;  %vm1145_vm7 = vcmp.eq.f32.partialorder %v3181_v19, 0.0  ;;  %v1034_v27 = vmul.f32 %v3137_v60, %v3105_v53 }
 0x15a   : >> { %v1650_v30 = vpop.eup %1649  ;;  %1661 = vrsqrt.f32 %v1163_v22  ;;  %v1123_v33 = vsel %vm1122_vm0, %v3160_v54, %v1121_v1  ;;  %v1146_v54 = vand.u32 2147483648, %v3181_v19  ;;  %v1035_v38 = vmul.f32 %v3141_v4, %v3107_v59 }
 0x15b   : >> { %v1652_v46 = vpop.eup %1651  ;;  %v1128_v21 = vmul.f32 %v1650_v30, %v3173_v26  ;;  %v1126_v34 = vsel %vm1124_vm3, %v1125_v12, %v1123_v33  ;;  %v1176_v57 = vadd.f32 %v1028_v37, %v3690_v41  ;;  %v1178_v60 = vadd.f32 %v1030_v23, %v3690_v41 }
 0x15c   : >> { %v1654_v62 = vpop.eup %1653  ;;  %v1135_v50 = vmul.f32 %v1652_v46, %v3179_v5  ;;  %v1179_v18 = vadd.f32 %v1031_v9, %v3690_v41 }
 0x15d   : >> { %v1142_v2 = vmul.f32 %v1654_v62, %v3181_v19  ;;  %v1130_v24 = vsel %vm1129_vm1, %v3173_v26, %v1128_v21  ;;  %v1177_v26 = vadd.f32 %v1029_v44, %v3690_v41 }
 0x15e   : >> { %v1137_v43 = vsel %vm1136_vm2, %v3179_v5, %v1135_v50  ;;  %v1133_v55 = vsel %vm1131_vm5, %v1132_v29, %v1130_v24  ;;  %v3691_v5 = vld [vmem:[#allocation88_spill] sm:$0xff] }
 0x15f   : >> { %v1144_v32 = vsel %vm1143_vm4, %v3181_v19, %v1142_v2  ;;  %v1140_v7 = vsel %vm1138_vm6, %v1139_v16, %v1137_v43  ;;  %v1197_v19 = vadd.f32 %v1032_v35, %v3691_v5  ;;  %v1198_v59 = vadd.f32 %v1033_v13, %v3691_v5 }
 0x160   : >> { %v1147_v45 = vsel %vm1145_vm7, %v1146_v54, %v1144_v32  ;;  %v1199_v52 = vadd.f32 %v1034_v27, %v3691_v5  ;;  %v1200_v6 = vadd.f32 %v1035_v38, %v3691_v5 }
 0x161   : >> { %v1656_v56 = vpop.eup %1655 }
 0x162   : >> { %v1658_v20 = vpop.eup %1657  ;;  %v1168_v51 = vmul.f32 %v1656_v56, %v1126_v34 }
 0x163   : >> { %v1660_v10 = vpop.eup %1659  ;;  %v1169_v53 = vmul.f32 %v1658_v20, %v1133_v55 }
 0x164   : >> { %v1662_v4 = vpop.eup %1661  ;;  %v1170_v61 = vmul.f32 %v1660_v10, %v1140_v7  ;;  %v1172_v11 = vmul.f32 %v1168_v51, %v3162_v3  ;;  %v1193_v36 = vmul.f32 %v1168_v51, %v3171_v0 }
 0x165   : >> { %v1171_v25 = vmul.f32 %v1662_v4, %v1147_v45  ;;  %v1173_v63 = vmul.f32 %v1169_v53, %v3164_v58  ;;  %v1194_v48 = vmul.f32 %v1169_v53, %v3175_v14  ;;  %304 = sbr.rel (!%p302_p4) target bundleno = 139 (0x8b), region = 96 }
 0x166   : >> { %v1174_v28 = vmul.f32 %v1170_v61, %v3166_v40  ;;  %v1180_v47 = vadd.f32 %v1176_v57, %v1172_v11  ;;  %v1195_v31 = vmul.f32 %v1170_v61, %v3177_v8  ;;  %v1201_v39 = vadd.f32 %v1197_v19, %v1193_v36 }
 0x167   : >> { %v1175_v3 = vmul.f32 %v1171_v25, %v3169_v17  ;;  %v1181_v0 = vadd.f32 %v1177_v26, %v1173_v63  ;;  %v1196_v42 = vmul.f32 %v1171_v25, %v3183_v49  ;;  %v1202_v15 = vadd.f32 %v1198_v59, %v1194_v48 }
 0x168   : >> { %v1182_v22 = vadd.f32 %v1178_v60, %v1174_v28  ;;  %1189 = vst [vmem:[%s1188_s1] sm:$0xff] %v1180_v47  ;;  %v1203_v58 = vadd.f32 %v1199_v52, %v1195_v31  ;;  %1207 = vst [vmem:[%s1206_s2] sm:$0xff] %v1201_v39 }
 0x169   : >> { %v1183_v14 = vadd.f32 %v1179_v18, %v1175_v3  ;;  %1190 = vst [vmem:[%s1188_s1 + $0x8] sm:$0xff] %v1181_v0  ;;  %v1204_v30 = vadd.f32 %v1200_v6, %v1196_v42  ;;  %1208 = vst [vmem:[%s1206_s2 + $0x8] sm:$0xff] %v1202_v15 }
 0x16a   : >> { %1191 = vst [vmem:[%s1188_s1 + $0x10] sm:$0xff] %v1182_v22  ;;  %1209 = vst [vmem:[%s1206_s2 + $0x10] sm:$0xff] %v1203_v58 }
 0x16b   : >> { %1192 = vst [vmem:[%s1188_s1 + $0x18] sm:$0xff] %v1183_v14  ;;  %1210 = vst [vmem:[%s1206_s2 + $0x18] sm:$0xff] %v1204_v30 }
 0x16c   : > { %1704 = shalt.err (!%p1701_p6)
}
 0x16d   : > { %s1705_s20 = scalar_lea.hbm %s3272_s0, 16384  ;;  %s1709_s27 = scalar_lea.hbm %s3693_s7, 32768 }
 0x16e   : > { %p1706_p7 = scmp.ne.s32.totalorder %s3272_s0, %s1705_s20  ;;  %p1710_p0 = scmp.lt.u32.totalorder %s3272_s0, %s3693_s7 }
 0x16f   : > { %p1711_p2 = scmp.lt.u32.totalorder %s1709_s27, %s1705_s20  ;;  %p1713_p8 = scmp.lt.u32.totalorder %s1705_s20, %s3272_s0 }
 0x170   : > { %p1707_p9 = pnand %p1706_p7, %p3694_p10 }
 0x171   : > { %p1712_p4 = por %p1711_p2, %p1710_p0 }
 0x172   : > { %p1708_p12 = pneg %p1707_p9 }
 0x173   : > { %p1714_p11 = por %p1713_p8, %p1712_p4 }
 0x175   : > { %p1715_p13 = pnand %p1714_p11, %p1708_p12 }
 0x177   : > { %1718 = shalt.err (!%p1715_p13)
}
 0x178   : > { %s1822_s18 = smov 512   ;;  %s1823_s19 = smov 32  }
 0x179   : > { %1492 = dma.vmem_to_hbm [thread:$0]  (%p3694_p10), %s3275_s8, 16384, %s3272_s0, %s1212_s12, %s1822_s18, %s1822_s18, %s1823_s19  }
 0x17a   : > { %s3695_s28 = sld [smem:[#allocation111_spill]]  ;;  %s1252_s25 = sshll.u32 %s2119_s24, 4  ;;  %s3312_s25 = int_to_ptr.vmem [resolvable:$true] %s1252_s25 }
 0x17b   : > { %s1217_s13 = scalar_lea.sflag [#allocation9], %s1948_s29  ;;  %s1719_s1 = scalar_lea.vmem %s3312_s25, 16384 }
 0x17c   : > { %p1720_p1 = scmp.ne.s32.totalorder %s3312_s25, %s1719_s1  ;;  %s1824_s2 = smov [#allocation8]  }
 0x17d   : > { %s1723_s5 = sshll.u32 %s1824_s2, 4  ;;  %s1724_s5 = int_to_ptr.vmem [resolvable:$false] %s1723_s5 }
 0x17e   : > { %p1721_p3 = pnand %p1720_p1, %p3694_p10  ;;  %s1725_s15 = scalar_lea.vmem %s1724_s5, 32768 }
 0x17f   : > { %p1726_p6 = scmp.lt.s32.totalorder %s3312_s25, %s1724_s5  ;;  %p1727_p7 = scmp.lt.s32.totalorder %s1725_s15, %s1719_s1 }
 0x180   : > { %s3309_s30 = scalar_lea.hbm %s3695_s28, %s1481_s4  ;;  %p1722_p5 = pneg %p1721_p3 }
 0x181   : > { %p1728_p9 = por %p1727_p7, %p1726_p6 }
 0x183   : > { %p1729_p12 = pnand %p1728_p9, %p1722_p5 }
 0x185   : > { %1732 = shalt.err (!%p1729_p12)
}
 0x186   : > { %s1733_s24 = scalar_lea.hbm %s3309_s30, 16384  ;;  %s1737_s0 = scalar_lea.hbm %s3695_s28, 32768 }
 0x187   : > { %p1734_p0 = scmp.ne.s32.totalorder %s3309_s30, %s1733_s24  ;;  %p1738_p8 = scmp.lt.u32.totalorder %s3309_s30, %s3695_s28 }
 0x188   : > { %p1739_p11 = scmp.lt.u32.totalorder %s1737_s0, %s1733_s24  ;;  %p1741_p1 = scmp.lt.u32.totalorder %s1733_s24, %s3309_s30 }
 0x189   : > { %p1735_p2 = pnand %p1734_p0, %p3694_p10 }
 0x18a   : > { %p1740_p13 = por %p1739_p11, %p1738_p8 }
 0x18b   : > { %p1736_p4 = pneg %p1735_p2 }
 0x18c   : > { %p1742_p3 = por %p1741_p1, %p1740_p13 }
 0x18e   : > { %p1743_p5 = pnand %p1742_p3, %p1736_p4 }
 0x190   : > { %1746 = shalt.err (!%p1743_p5)
}
 0x191   : > { %1493 = dma.vmem_to_hbm [thread:$0]  (%p3694_p10), %s3312_s25, 16384, %s3309_s30, %s1217_s13, %s1822_s18, %s1822_s18, %s1823_s19  }
 0x192 PF: > { %s3696_s9 = sld [smem:[#allocation18_spill]]  ;;  %s3697_s14 = sld [smem:[#allocation14_spill]] }
 0x193   : > { %s3698_s16 = sld [smem:[#allocation21_spill]] }
 0x198   : > { %p1514_p6 = scmp.ge.s32.totalorder %s3696_s9, 2  ;;  %s1267_s17 = sand.u32 1, %s3697_s14  }
 0x199   : > { %p3699_p7 = scmp.ne.s32.totalorder %s3698_s16, 0  ;;  %s1268_s20 = scalar_lea.sflag [#allocation3], %s1267_s17 }
 0x19b   : > { %p1504_p9 = pnand %p1514_p6, %p3699_p7 }
 0x19d   : > { %1784 = dma.done.wait (!%p1504_p9), %s1268_s20, 16384  }
 0x19e   : > { %1786 = vsyncadd (!%p1504_p9), %s1268_s20, 4294950912  ;;  %s1277_s3 = scalar_lea.sflag [#allocation9], %s1267_s17 }
 0x19f   : > { %1788 = dma.done.wait (!%p1504_p9), %s1277_s3, 16384  }
 0x1a0   : > { %1790 = vsyncadd (!%p1504_p9), %s1277_s3, 4294950912  ;;  %s22_s17 = sadd.s32 1, %s3696_s9   ;;  %s3700_s12 = sld [smem:[#allocation15_spill]] }
 0x1a1   : > { %p19_p12 = scmp.ge.s32.totalorder %s22_s17, 4   ;;  %s3701_s13 = sld [smem:[#allocation16_spill]] }
 0x1a2   : > { %s3702_s14 = sld [smem:[#allocation22_spill]]  ;;  %s3703_s15 = sld [smem:[#allocation17_spill]] }
 0x1a3   : > { %s3704_s16 = sld [smem:[#allocation19_spill]]  ;;  %21 = sbr.rel (!%p19_p12) target bundleno = 13 (0xd), region = 107 }
 0x1aa   :  { %1282 = vsyncpa [#allocation3], 1 }
 0x1ab   :  { %1284 = vsyncpa [#allocation3 + $0x1], 1 }
 0x1ac   :  { %1285 = vsyncpa [#allocation9], 1 }
 0x1ad   :  { %1287 = vsyncpa [#allocation9 + $0x1], 1 }
 0x1ae   :  { %1288 = vsyncpa [#allocation4], 1 }
 0x1af   :  { %1290 = vsyncpa [#allocation4 + $0x1], 1 }
 0x1b0   :  { %1291 = vsyncpa [#allocation5], 1 }
 0x1b1   :  { %1293 = vsyncpa [#allocation5 + $0x1], 1 }

</bundles_post_ra>
